<compile_context>
chip_gen: v7x
topology: tpu7x:2x2x1
jax: 0.10.0
libtpu: 0.0.40
codegen_flags: <defaults>
</compile_context>

<pallas_src>
import math
import functools

import jax
import jax.numpy as jnp
import numpy as np
from jax import lax
from jax.experimental import pallas as pl
from jax.experimental.pallas import tpu as pltpu

# ---- model hyper-parameters (small, consistent with the module) -------------
D_MODEL = 32
NUM_HEADS = 4
HEAD_DIM = D_MODEL // NUM_HEADS
D_FF = 2048          # FeedForward default d_ff
BATCH = 2
SEQ = 8
LN_EPS = 1e-5


def _layer_norm(v, gamma, beta):
    # v: (R, D), gamma/beta: (1, D). PyTorch LayerNorm uses biased variance.
    mu = jnp.mean(v, axis=-1, keepdims=True)
    var = jnp.mean((v - mu) ** 2, axis=-1, keepdims=True)
    return (v - mu) * lax.rsqrt(var + LN_EPS) * gamma + beta


def encoder_layer_kernel(
    x_ref,       # (B*S, D)    f32
    wqkvo_ref,   # (D, 4D)     f32   columns: [wq*scale | wk | wv | wo]
    vec_ref,     # (9, D)      f32   rows: bq*scale, bk, bv, bo, g1, be1, b2, g2, be2
    w12_ref,     # (2D, D_FF)  bf16  rows [0:D)=w1, [D:2D)=w2^T (lane-dense)
    b1_ref,      # (1, D_FF)   f32
    o_ref,       # (B*S, D)
    *, batch, seq, num_heads, head_dim,
):
    d = num_heads * head_dim
    x = x_ref[...]                                              # (B*S, D)

    # ---- fused Q/K/V projection (1/sqrt(hd) folded into wq/bq host-side) ----
    qkv = jnp.dot(x, wqkvo_ref[:, 0:3 * d],
                  preferred_element_type=jnp.float32)           # (B*S, 3D)

    def split_heads(col, bias_row):
        # slice q/k/v, add bias, stack heads onto the leading (batch) axis.
        t = qkv[:, col * d:(col + 1) * d] + vec_ref[bias_row:bias_row + 1, :]
        t = t.reshape(batch, seq, d)                            # major-dim split
        return jnp.concatenate(
            [t[:, :, h * head_dim:(h + 1) * head_dim] for h in range(num_heads)],
            axis=0)                                             # (H*B, S, hd)

    qh = split_heads(0, 0)
    kh = split_heads(1, 1)
    vh = split_heads(2, 2)

    # ---- scaled dot-product attention: ONE pair of batched einsums ----------
    # TODO(synk): optional attention mask (mask==0 -> -1e9) not wired in; the
    # reference forward is exercised with mask=None.
    s = jnp.einsum("bqd,bkd->bqk", qh, kh,
                   preferred_element_type=jnp.float32)          # (H*B, S, S)
    s = s - jnp.max(s, axis=-1, keepdims=True)
    p = jnp.exp(s)
    p = p * pl.reciprocal(jnp.sum(p, axis=-1, keepdims=True), approx=True)
    ao = jnp.einsum("bqk,bkd->bqd", p, vh,
                    preferred_element_type=jnp.float32)         # (H*B, S, hd)

    # undo the head stacking: heads back onto the lane (feature) axis
    attn = jnp.concatenate(
        [ao[h * batch:(h + 1) * batch] for h in range(num_heads)],
        axis=-1).reshape(batch * seq, d)                        # (B*S, D)

    attn = jnp.dot(attn, wqkvo_ref[:, 3 * d:4 * d],
                   preferred_element_type=jnp.float32) + vec_ref[3:4, :]

    # ---- residual + LayerNorm 1 (dropout = identity) -------------------------
    x1 = _layer_norm(x + attn, vec_ref[4:5, :], vec_ref[5:6, :])

    # ---- feed-forward: bf16 operands straight to the MXU, f32 accumulation ---
    h1 = jnp.dot(x1.astype(jnp.bfloat16), w12_ref[0:d, :],
                 preferred_element_type=jnp.float32) + b1_ref[...]
    h1 = jnp.maximum(h1, 0.0)
    # w2^T stays in its lane-dense (D, D_FF) layout; contract the D_FF dims
    # directly (A @ B^T form) instead of materialising a (D_FF, D) tile.
    ffn = lax.dot_general(h1.astype(jnp.bfloat16), w12_ref[d:2 * d, :],
                          dimension_numbers=(((1,), (1,)), ((), ())),
                          preferred_element_type=jnp.float32) + vec_ref[6:7, :]

    # ---- residual + LayerNorm 2 ----------------------------------------------
    out = _layer_norm(x1 + ffn, vec_ref[7:8, :], vec_ref[8:9, :])
    o_ref[...] = out.astype(o_ref.dtype)


def pack_params(params):
    """Host-side packing, done ONCE per weight set (hoisted out of call path)."""
    scale = 1.0 / math.sqrt(HEAD_DIM)
    wqkvo = jnp.concatenate(
        [params["wq"] * scale, params["wk"], params["wv"], params["wo"]],
        axis=1)                                                  # (32, 128) f32
    vecs = jnp.concatenate(
        [params["bq"] * scale, params["bk"], params["bv"], params["bo"],
         params["g1"], params["be1"], params["b2"], params["g2"],
         params["be2"]], axis=0)                                 # (9, 32) f32
    w12 = jnp.concatenate([params["w1"], params["w2"].T],
                          axis=0).astype(jnp.bfloat16)           # (64, 2048) bf16
    return dict(wqkvo=wqkvo, vecs=vecs, w12=w12, b1=params["b1"])


@jax.jit
def encoder_layer_pallas(x, wqkvo, vecs, w12, b1):
    B, S, D = x.shape
    x2 = x.reshape(B * S, D)     # fold batch into rows: one grid step total
    args = (x2, wqkvo, vecs, w12, b1)

    def full_spec(shape):
        n = len(shape)
        return pl.BlockSpec(shape, lambda i, n=n: (0,) * n)

    kernel = functools.partial(
        encoder_layer_kernel, batch=B, seq=S,
        num_heads=NUM_HEADS, head_dim=HEAD_DIM)

    out2 = pl.pallas_call(
        kernel,
        out_shape=jax.ShapeDtypeStruct((B * S, D), x.dtype),
        grid_spec=pltpu.PrefetchScalarGridSpec(
            num_scalar_prefetch=0,
            grid=(1,),   # single step: launch + weight DMA paid exactly once.
            in_specs=[full_spec(a.shape) for a in args],
            out_specs=full_spec((B * S, D)),
        ),
        compiler_params=pltpu.CompilerParams(
            dimension_semantics=("arbitrary",),
        ),
    )(*args)
    return out2.reshape(B, S, D)


# ---- pure-JAX reference (f32 master weights, matches the PyTorch module) ----
def encoder_layer_ref(x, p):
    def ln(v, g, b):
        mu = jnp.mean(v, axis=-1, keepdims=True)
        var = jnp.mean((v - mu) ** 2, axis=-1, keepdims=True)
        return (v - mu) / jnp.sqrt(var + LN_EPS) * g + b

    B, S, D = x.shape
    q = x @ p["wq"] + p["bq"]
    k = x @ p["wk"] + p["bk"]
    v = x @ p["wv"] + p["bv"]
    q = q.reshape(B, S, NUM_HEADS, HEAD_DIM).transpose(0, 2, 1, 3)
    k = k.reshape(B, S, NUM_HEADS, HEAD_DIM).transpose(0, 2, 1, 3)
    v = v.reshape(B, S, NUM_HEADS, HEAD_DIM).transpose(0, 2, 1, 3)
    s = jnp.einsum("bhqd,bhkd->bhqk", q, k) / math.sqrt(HEAD_DIM)
    pr = jax.nn.softmax(s, axis=-1)
    a = jnp.einsum("bhqk,bhkd->bhqd", pr, v)
    a = a.transpose(0, 2, 1, 3).reshape(B, S, D)
    a = a @ p["wo"] + p["bo"]
    x1 = ln(x + a, p["g1"], p["be1"])
    h1 = jnp.maximum(x1 @ p["w1"] + p["b1"], 0.0)
    ffn = h1 @ p["w2"] + p["b2"]
    return ln(x1 + ffn, p["g2"], p["be2"])


def init_params(key):
    keys = jax.random.split(key, 12)

    def lin(kw, kb, fan_in, fan_out):
        bound = 1.0 / math.sqrt(fan_in)
        w = jax.random.uniform(kw, (fan_in, fan_out), jnp.float32, -bound, bound)
        b = jax.random.uniform(kb, (1, fan_out), jnp.float32, -bound, bound)
        return w, b

    wq, bq = lin(keys[0], keys[1], D_MODEL, D_MODEL)
    wk, bk = lin(keys[2], keys[3], D_MODEL, D_MODEL)
    wv, bv = lin(keys[4], keys[5], D_MODEL, D_MODEL)
    wo, bo = lin(keys[6], keys[7], D_MODEL, D_MODEL)
    w1, b1 = lin(keys[8], keys[9], D_MODEL, D_FF)
    w2, b2 = lin(keys[10], keys[11], D_FF, D_MODEL)
    return dict(
        wq=wq, bq=bq, wk=wk, bk=bk, wv=wv, bv=bv, wo=wo, bo=bo,
        w1=w1, b1=b1, w2=w2, b2=b2,
        g1=jnp.ones((1, D_MODEL), jnp.float32),
        be1=jnp.zeros((1, D_MODEL), jnp.float32),
        g2=jnp.ones((1, D_MODEL), jnp.float32),
        be2=jnp.zeros((1, D_MODEL), jnp.float32),
    )


if __name__ == "__main__":
    key = jax.random.PRNGKey(0)
    k_x, k_p = jax.random.split(key)
    x = jax.random.normal(k_x, (BATCH, SEQ, D_MODEL), jnp.float32)
    params = init_params(k_p)

    packed = pack_params(params)   # packed once, reused across calls
    out = encoder_layer_pallas(x, packed["wqkvo"], packed["vecs"],
                               packed["w12"], packed["b1"])
    out = jax.block_until_ready(out)

    ref = encoder_layer_ref(x, params)
    # Tolerance reflects deliberate inference-mode approximations: bf16-stored
    # FFN weights, bf16 FFN activations (f32 accumulation), and the approx
    # (EUP) reciprocal in the softmax denominator.
    np.testing.assert_allclose(np.asarray(out), np.asarray(ref), rtol=2e-2, atol=2e-2)

    print("KERNEL_OK")
</pallas_src>

<mosaic_0001>
module attributes {stable_mosaic.version = 11 : i64} {
  func.func @encoder_layer_kernel(%arg0: i32, %arg1: memref<16x32xf32, #tpu.memory_space<vmem>>, %arg2: memref<32x128xf32, #tpu.memory_space<vmem>>, %arg3: memref<9x32xf32, #tpu.memory_space<vmem>>, %arg4: memref<64x2048xbf16, #tpu.memory_space<vmem>>, %arg5: memref<1x2048xf32, #tpu.memory_space<vmem>>, %arg6: memref<16x32xf32, #tpu.memory_space<vmem>>) attributes {dimension_semantics = [#tpu.dimension_semantics<arbitrary>], iteration_bounds = array<i64: 1>, scalar_prefetch = 0 : i64, scratch_operands = 0 : i64, tpu.core_type = #tpu.core_type<tc>, window_params = [{pipeline_mode = #tpu.pipeline_mode<synchronous>, transform_indices = @transform_0, window_bounds = array<i64: 16, 32>}, {pipeline_mode = #tpu.pipeline_mode<synchronous>, transform_indices = @transform_1, window_bounds = array<i64: 32, 128>}, {pipeline_mode = #tpu.pipeline_mode<synchronous>, transform_indices = @transform_2, window_bounds = array<i64: 9, 32>}, {pipeline_mode = #tpu.pipeline_mode<synchronous>, transform_indices = @transform_3, window_bounds = array<i64: 64, 2048>}, {pipeline_mode = #tpu.pipeline_mode<synchronous>, transform_indices = @transform_4, window_bounds = array<i64: 1, 2048>}, {pipeline_mode = #tpu.pipeline_mode<synchronous>, transform_indices = @transform_5, window_bounds = array<i64: 16, 32>}]} {
    %c0 = arith.constant 0 : index
    %c0_0 = arith.constant 0 : index
    %0 = vector.load %arg1[%c0, %c0_0] : memref<16x32xf32, #tpu.memory_space<vmem>>, vector<16x32xf32>
    %c0_1 = arith.constant 0 : index
    %c0_2 = arith.constant 0 : index
    %1 = vector.load %arg2[%c0_1, %c0_2] : memref<32x128xf32, #tpu.memory_space<vmem>>, vector<32x96xf32>
    %cst = arith.constant dense<0.000000e+00> : vector<16x96xf32>
    %2 = tpu.matmul %0, %1, %cst {dimension_numbers = #tpu.dot_dimension_numbers<[1], [0], [0], [1], [0, 0, 1, 1], [], []>} : vector<16x32xf32>, vector<32x96xf32>, vector<16x96xf32> -> vector<16x96xf32>
    %3 = vector.extract_strided_slice %2 {offsets = [0, 0], sizes = [16, 32], strides = [1, 1]} : vector<16x96xf32> to vector<16x32xf32>
    %c0_3 = arith.constant 0 : index
    %c0_4 = arith.constant 0 : index
    %4 = vector.load %arg3[%c0_3, %c0_4] : memref<9x32xf32, #tpu.memory_space<vmem>>, vector<1x32xf32>
    %5 = vector.broadcast %4 : vector<1x32xf32> to vector<16x32xf32>
    %6 = arith.addf %3, %5 : vector<16x32xf32>
    %7 = vector.shape_cast %6 : vector<16x32xf32> to vector<2x8x32xf32>
    %8 = vector.extract_strided_slice %7 {offsets = [0, 0, 0], sizes = [2, 8, 8], strides = [1, 1, 1]} : vector<2x8x32xf32> to vector<2x8x8xf32>
    %9 = vector.extract_strided_slice %7 {offsets = [0, 0, 8], sizes = [2, 8, 8], strides = [1, 1, 1]} : vector<2x8x32xf32> to vector<2x8x8xf32>
    %10 = vector.extract_strided_slice %7 {offsets = [0, 0, 16], sizes = [2, 8, 8], strides = [1, 1, 1]} : vector<2x8x32xf32> to vector<2x8x8xf32>
    %11 = vector.extract_strided_slice %7 {offsets = [0, 0, 24], sizes = [2, 8, 8], strides = [1, 1, 1]} : vector<2x8x32xf32> to vector<2x8x8xf32>
    %12 = tpu.concatenate %8, %9, %10, %11 in 0 : vector<2x8x8xf32>, vector<2x8x8xf32>, vector<2x8x8xf32>, vector<2x8x8xf32> -> vector<8x8x8xf32>
    %13 = vector.extract_strided_slice %2 {offsets = [0, 32], sizes = [16, 32], strides = [1, 1]} : vector<16x96xf32> to vector<16x32xf32>
    %c1 = arith.constant 1 : index
    %c0_5 = arith.constant 0 : index
    %14 = vector.load %arg3[%c1, %c0_5] : memref<9x32xf32, #tpu.memory_space<vmem>>, vector<1x32xf32>
    %15 = vector.broadcast %14 : vector<1x32xf32> to vector<16x32xf32>
    %16 = arith.addf %13, %15 : vector<16x32xf32>
    %17 = vector.shape_cast %16 : vector<16x32xf32> to vector<2x8x32xf32>
    %18 = vector.extract_strided_slice %17 {offsets = [0, 0, 0], sizes = [2, 8, 8], strides = [1, 1, 1]} : vector<2x8x32xf32> to vector<2x8x8xf32>
    %19 = vector.extract_strided_slice %17 {offsets = [0, 0, 8], sizes = [2, 8, 8], strides = [1, 1, 1]} : vector<2x8x32xf32> to vector<2x8x8xf32>
    %20 = vector.extract_strided_slice %17 {offsets = [0, 0, 16], sizes = [2, 8, 8], strides = [1, 1, 1]} : vector<2x8x32xf32> to vector<2x8x8xf32>
    %21 = vector.extract_strided_slice %17 {offsets = [0, 0, 24], sizes = [2, 8, 8], strides = [1, 1, 1]} : vector<2x8x32xf32> to vector<2x8x8xf32>
    %22 = tpu.concatenate %18, %19, %20, %21 in 0 : vector<2x8x8xf32>, vector<2x8x8xf32>, vector<2x8x8xf32>, vector<2x8x8xf32> -> vector<8x8x8xf32>
    %23 = vector.extract_strided_slice %2 {offsets = [0, 64], sizes = [16, 32], strides = [1, 1]} : vector<16x96xf32> to vector<16x32xf32>
    %c2 = arith.constant 2 : index
    %c0_6 = arith.constant 0 : index
    %24 = vector.load %arg3[%c2, %c0_6] : memref<9x32xf32, #tpu.memory_space<vmem>>, vector<1x32xf32>
    %25 = vector.broadcast %24 : vector<1x32xf32> to vector<16x32xf32>
    %26 = arith.addf %23, %25 : vector<16x32xf32>
    %27 = vector.shape_cast %26 : vector<16x32xf32> to vector<2x8x32xf32>
    %28 = vector.extract_strided_slice %27 {offsets = [0, 0, 0], sizes = [2, 8, 8], strides = [1, 1, 1]} : vector<2x8x32xf32> to vector<2x8x8xf32>
    %29 = vector.extract_strided_slice %27 {offsets = [0, 0, 8], sizes = [2, 8, 8], strides = [1, 1, 1]} : vector<2x8x32xf32> to vector<2x8x8xf32>
    %30 = vector.extract_strided_slice %27 {offsets = [0, 0, 16], sizes = [2, 8, 8], strides = [1, 1, 1]} : vector<2x8x32xf32> to vector<2x8x8xf32>
    %31 = vector.extract_strided_slice %27 {offsets = [0, 0, 24], sizes = [2, 8, 8], strides = [1, 1, 1]} : vector<2x8x32xf32> to vector<2x8x8xf32>
    %32 = tpu.concatenate %28, %29, %30, %31 in 0 : vector<2x8x8xf32>, vector<2x8x8xf32>, vector<2x8x8xf32>, vector<2x8x8xf32> -> vector<8x8x8xf32>
    "tpu.trace_start"() <{level = 10 : i32, message = "bqd,bkd->bqk"}> : () -> ()
    %cst_7 = arith.constant dense<0.000000e+00> : vector<8x8x8xf32>
    %33 = tpu.matmul %12, %22, %cst_7 {dimension_numbers = #tpu.dot_dimension_numbers<[2], [2], [1], [1], [0, 0, 0, 1, 1, 1], [0], [0]>} : vector<8x8x8xf32>, vector<8x8x8xf32>, vector<8x8x8xf32> -> vector<8x8x8xf32>
    "tpu.trace_stop"() : () -> ()
    %cst_8 = arith.constant dense<0xFF800000> : vector<8x8xf32>
    %34 = vector.multi_reduction <maximumf>, %33, %cst_8 [2] : vector<8x8x8xf32> to vector<8x8xf32>
    %35 = vector.shape_cast %34 : vector<8x8xf32> to vector<8x8x1xf32>
    %36 = vector.broadcast %35 : vector<8x8x1xf32> to vector<8x8x8xf32>
    %37 = arith.subf %33, %36 : vector<8x8x8xf32>
    %38 = math.exp %37 : vector<8x8x8xf32>
    %cst_9 = arith.constant dense<0.000000e+00> : vector<8x8xf32>
    %39 = vector.multi_reduction <add>, %38, %cst_9 [2] : vector<8x8x8xf32> to vector<8x8xf32>
    %40 = vector.shape_cast %39 : vector<8x8xf32> to vector<8x8x1xf32>
    %41 = tpu.reciprocal %40 {approx = true} : vector<8x8x1xf32> -> vector<8x8x1xf32>
    %42 = vector.broadcast %41 : vector<8x8x1xf32> to vector<8x8x8xf32>
    %43 = arith.mulf %38, %42 : vector<8x8x8xf32>
    "tpu.trace_start"() <{level = 10 : i32, message = "bqk,bkd->bqd"}> : () -> ()
    %cst_10 = arith.constant dense<0.000000e+00> : vector<8x8x8xf32>
    %44 = tpu.matmul %43, %32, %cst_10 {dimension_numbers = #tpu.dot_dimension_numbers<[2], [1], [1], [2], [0, 0, 0, 1, 1, 2], [0], [0]>} : vector<8x8x8xf32>, vector<8x8x8xf32>, vector<8x8x8xf32> -> vector<8x8x8xf32>
    "tpu.trace_stop"() : () -> ()
    %45 = vector.extract_strided_slice %44 {offsets = [0, 0, 0], sizes = [2, 8, 8], strides = [1, 1, 1]} : vector<8x8x8xf32> to vector<2x8x8xf32>
    %46 = vector.extract_strided_slice %44 {offsets = [2, 0, 0], sizes = [2, 8, 8], strides = [1, 1, 1]} : vector<8x8x8xf32> to vector<2x8x8xf32>
    %47 = vector.extract_strided_slice %44 {offsets = [4, 0, 0], sizes = [2, 8, 8], strides = [1, 1, 1]} : vector<8x8x8xf32> to vector<2x8x8xf32>
    %48 = vector.extract_strided_slice %44 {offsets = [6, 0, 0], sizes = [2, 8, 8], strides = [1, 1, 1]} : vector<8x8x8xf32> to vector<2x8x8xf32>
    %49 = tpu.concatenate %45, %46, %47, %48 in 2 : vector<2x8x8xf32>, vector<2x8x8xf32>, vector<2x8x8xf32>, vector<2x8x8xf32> -> vector<2x8x32xf32>
    %50 = vector.shape_cast %49 : vector<2x8x32xf32> to vector<16x32xf32>
    %c0_11 = arith.constant 0 : index
    %c96 = arith.constant 96 : index
    %51 = vector.load %arg2[%c0_11, %c96] : memref<32x128xf32, #tpu.memory_space<vmem>>, vector<32x32xf32>
    %cst_12 = arith.constant dense<0.000000e+00> : vector<16x32xf32>
    %52 = tpu.matmul %50, %51, %cst_12 {dimension_numbers = #tpu.dot_dimension_numbers<[1], [0], [0], [1], [0, 0, 1, 1], [], []>} : vector<16x32xf32>, vector<32x32xf32>, vector<16x32xf32> -> vector<16x32xf32>
    %c3 = arith.constant 3 : index
    %c0_13 = arith.constant 0 : index
    %53 = vector.load %arg3[%c3, %c0_13] : memref<9x32xf32, #tpu.memory_space<vmem>>, vector<1x32xf32>
    %54 = vector.broadcast %53 : vector<1x32xf32> to vector<16x32xf32>
    %55 = arith.addf %52, %54 : vector<16x32xf32>
    %56 = arith.addf %0, %55 : vector<16x32xf32>
    %c4 = arith.constant 4 : index
    %c0_14 = arith.constant 0 : index
    %57 = vector.load %arg3[%c4, %c0_14] : memref<9x32xf32, #tpu.memory_space<vmem>>, vector<1x32xf32>
    %c5 = arith.constant 5 : index
    %c0_15 = arith.constant 0 : index
    %58 = vector.load %arg3[%c5, %c0_15] : memref<9x32xf32, #tpu.memory_space<vmem>>, vector<1x32xf32>
    %cst_16 = arith.constant dense<0.000000e+00> : vector<16xf32>
    %59 = vector.multi_reduction <add>, %56, %cst_16 [1] : vector<16x32xf32> to vector<16xf32>
    %60 = vector.shape_cast %59 : vector<16xf32> to vector<16x1xf32>
    %cst_17 = arith.constant 3.200000e+01 : f32
    %61 = vector.broadcast %cst_17 : f32 to vector<16x1xf32>
    %62 = arith.divf %60, %61 : vector<16x1xf32>
    %63 = vector.broadcast %62 : vector<16x1xf32> to vector<16x32xf32>
    %64 = arith.subf %56, %63 : vector<16x32xf32>
    %65 = arith.mulf %64, %64 : vector<16x32xf32>
    %cst_18 = arith.constant dense<0.000000e+00> : vector<16xf32>
    %66 = vector.multi_reduction <add>, %65, %cst_18 [1] : vector<16x32xf32> to vector<16xf32>
    %67 = vector.shape_cast %66 : vector<16xf32> to vector<16x1xf32>
    %cst_19 = arith.constant 3.200000e+01 : f32
    %68 = vector.broadcast %cst_19 : f32 to vector<16x1xf32>
    %69 = arith.divf %67, %68 : vector<16x1xf32>
    %70 = vector.broadcast %62 : vector<16x1xf32> to vector<16x32xf32>
    %71 = arith.subf %56, %70 : vector<16x32xf32>
    %cst_20 = arith.constant 9.99999974E-6 : f32
    %72 = vector.broadcast %cst_20 : f32 to vector<16x1xf32>
    %73 = arith.addf %69, %72 : vector<16x1xf32>
    %74 = math.rsqrt %73 : vector<16x1xf32>
    %75 = vector.broadcast %74 : vector<16x1xf32> to vector<16x32xf32>
    %76 = arith.mulf %71, %75 : vector<16x32xf32>
    %77 = vector.broadcast %57 : vector<1x32xf32> to vector<16x32xf32>
    %78 = arith.mulf %76, %77 : vector<16x32xf32>
    %79 = vector.broadcast %58 : vector<1x32xf32> to vector<16x32xf32>
    %80 = arith.addf %78, %79 : vector<16x32xf32>
    %81 = arith.truncf %80 : vector<16x32xf32> to vector<16x32xbf16>
    %c0_21 = arith.constant 0 : index
    %c0_22 = arith.constant 0 : index
    %82 = vector.load %arg4[%c0_21, %c0_22] : memref<64x2048xbf16, #tpu.memory_space<vmem>>, vector<32x2048xbf16>
    %cst_23 = arith.constant dense<0.000000e+00> : vector<16x2048xf32>
    %83 = tpu.matmul %81, %82, %cst_23 {dimension_numbers = #tpu.dot_dimension_numbers<[1], [0], [0], [1], [0, 0, 1, 1], [], []>} : vector<16x32xbf16>, vector<32x2048xbf16>, vector<16x2048xf32> -> vector<16x2048xf32>
    %c0_24 = arith.constant 0 : index
    %c0_25 = arith.constant 0 : index
    %84 = vector.load %arg5[%c0_24, %c0_25] : memref<1x2048xf32, #tpu.memory_space<vmem>>, vector<1x2048xf32>
    %85 = vector.broadcast %84 : vector<1x2048xf32> to vector<16x2048xf32>
    %86 = arith.addf %83, %85 : vector<16x2048xf32>
    %cst_26 = arith.constant 0.000000e+00 : f32
    %87 = vector.broadcast %cst_26 : f32 to vector<16x2048xf32>
    %88 = arith.maximumf %86, %87 : vector<16x2048xf32>
    %89 = arith.truncf %88 : vector<16x2048xf32> to vector<16x2048xbf16>
    %c32 = arith.constant 32 : index
    %c0_27 = arith.constant 0 : index
    %90 = vector.load %arg4[%c32, %c0_27] : memref<64x2048xbf16, #tpu.memory_space<vmem>>, vector<32x2048xbf16>
    %cst_28 = arith.constant dense<0.000000e+00> : vector<16x32xf32>
    %91 = tpu.matmul %89, %90, %cst_28 {dimension_numbers = #tpu.dot_dimension_numbers<[1], [1], [0], [0], [0, 0, 1, 0], [], []>} : vector<16x2048xbf16>, vector<32x2048xbf16>, vector<16x32xf32> -> vector<16x32xf32>
    %c6 = arith.constant 6 : index
    %c0_29 = arith.constant 0 : index
    %92 = vector.load %arg3[%c6, %c0_29] : memref<9x32xf32, #tpu.memory_space<vmem>>, vector<1x32xf32>
    %93 = vector.broadcast %92 : vector<1x32xf32> to vector<16x32xf32>
    %94 = arith.addf %91, %93 : vector<16x32xf32>
    %95 = arith.addf %80, %94 : vector<16x32xf32>
    %c7 = arith.constant 7 : index
    %c0_30 = arith.constant 0 : index
    %96 = vector.load %arg3[%c7, %c0_30] : memref<9x32xf32, #tpu.memory_space<vmem>>, vector<1x32xf32>
    %c8 = arith.constant 8 : index
    %c0_31 = arith.constant 0 : index
    %97 = vector.load %arg3[%c8, %c0_31] : memref<9x32xf32, #tpu.memory_space<vmem>>, vector<1x32xf32>
    %cst_32 = arith.constant dense<0.000000e+00> : vector<16xf32>
    %98 = vector.multi_reduction <add>, %95, %cst_32 [1] : vector<16x32xf32> to vector<16xf32>
    %99 = vector.shape_cast %98 : vector<16xf32> to vector<16x1xf32>
    %cst_33 = arith.constant 3.200000e+01 : f32
    %100 = vector.broadcast %cst_33 : f32 to vector<16x1xf32>
    %101 = arith.divf %99, %100 : vector<16x1xf32>
    %102 = vector.broadcast %101 : vector<16x1xf32> to vector<16x32xf32>
    %103 = arith.subf %95, %102 : vector<16x32xf32>
    %104 = arith.mulf %103, %103 : vector<16x32xf32>
    %cst_34 = arith.constant dense<0.000000e+00> : vector<16xf32>
    %105 = vector.multi_reduction <add>, %104, %cst_34 [1] : vector<16x32xf32> to vector<16xf32>
    %106 = vector.shape_cast %105 : vector<16xf32> to vector<16x1xf32>
    %cst_35 = arith.constant 3.200000e+01 : f32
    %107 = vector.broadcast %cst_35 : f32 to vector<16x1xf32>
    %108 = arith.divf %106, %107 : vector<16x1xf32>
    %109 = vector.broadcast %101 : vector<16x1xf32> to vector<16x32xf32>
    %110 = arith.subf %95, %109 : vector<16x32xf32>
    %cst_36 = arith.constant 9.99999974E-6 : f32
    %111 = vector.broadcast %cst_36 : f32 to vector<16x1xf32>
    %112 = arith.addf %108, %111 : vector<16x1xf32>
    %113 = math.rsqrt %112 : vector<16x1xf32>
    %114 = vector.broadcast %113 : vector<16x1xf32> to vector<16x32xf32>
    %115 = arith.mulf %110, %114 : vector<16x32xf32>
    %116 = vector.broadcast %96 : vector<1x32xf32> to vector<16x32xf32>
    %117 = arith.mulf %115, %116 : vector<16x32xf32>
    %118 = vector.broadcast %97 : vector<1x32xf32> to vector<16x32xf32>
    %119 = arith.addf %117, %118 : vector<16x32xf32>
    %c0_37 = arith.constant 0 : index
    %c0_38 = arith.constant 0 : index
    %120 = vector.load %arg6[%c0_37, %c0_38] : memref<16x32xf32, #tpu.memory_space<vmem>>, vector<16x32xf32>
    tpu.vector_store %arg6[%c0_37, %c0_38], %119 {strides = array<i32>} : memref<16x32xf32, #tpu.memory_space<vmem>>, vector<16x32xf32>,
    return
  }
  func.func @transform_0(%arg0: i32) -> (i32, i32) {
    %c0_i32 = arith.constant 0 : i32
    %c0_i32_0 = arith.constant 0 : i32
    %c0_i32_1 = arith.constant 0 : i32
    return %c0_i32, %c0_i32_0 : i32, i32
  }
  func.func @transform_1(%arg0: i32) -> (i32, i32) {
    %c0_i32 = arith.constant 0 : i32
    %c0_i32_0 = arith.constant 0 : i32
    %c0_i32_1 = arith.constant 0 : i32
    return %c0_i32, %c0_i32_0 : i32, i32
  }
  func.func @transform_2(%arg0: i32) -> (i32, i32) {
    %c0_i32 = arith.constant 0 : i32
    %c0_i32_0 = arith.constant 0 : i32
    %c0_i32_1 = arith.constant 0 : i32
    return %c0_i32, %c0_i32_0 : i32, i32
  }
  func.func @transform_3(%arg0: i32) -> (i32, i32) {
    %c0_i32 = arith.constant 0 : i32
    %c0_i32_0 = arith.constant 0 : i32
    %c0_i32_1 = arith.constant 0 : i32
    return %c0_i32, %c0_i32_0 : i32, i32
  }
  func.func @transform_4(%arg0: i32) -> (i32, i32) {
    %c0_i32 = arith.constant 0 : i32
    %c0_i32_0 = arith.constant 0 : i32
    %c0_i32_1 = arith.constant 0 : i32
    return %c0_i32, %c0_i32_0 : i32, i32
  }
  func.func @transform_5(%arg0: i32) -> (i32, i32) {
    %c0_i32 = arith.constant 0 : i32
    %c0_i32_0 = arith.constant 0 : i32
    %c0_i32_1 = arith.constant 0 : i32
    return %c0_i32, %c0_i32_0 : i32, i32
  }
}

</mosaic_0001>

<bundles_post_ra>
// kernel: encoder_layer_pallas.1
= control target key start
LH: loop header
LB: loop body
LE: loop exit
PB: predicated region body
PF: predicated region fallthrough
CT: control target
= control target key end

     0   :  { %10 = vsyncpa [#allocation3], 0  ;;  %s3940_s0 = inlined_call_operand.hbm [shape: f32[16,32], index: 0, kind: input, shape index: {}]   ;;  %s3941_s1 = inlined_call_operand.hbm [shape: f32[32,128], index: 1, kind: input, shape index: {}]   ;;  %s3942_s2 = inlined_call_operand.hbm [shape: f32[9,32], index: 2, kind: input, shape index: {}]   ;;  %s3943_s3 = inlined_call_operand.hbm [shape: bf16[64,2048], index: 3, kind: input, shape index: {}]   ;;  %s3944_s4 = inlined_call_operand.vmem [shape: f32[1,2048], index: 4, kind: input, shape index: {}]   ;;  %s3945_s5 = inlined_call_operand.hbm [shape: f32[16,32], index: 5, kind: output, shape index: {}]  }
   0x1   :  { %11 = vsyncpa [#allocation6], 0 }
   0x2   :  { %12 = vsyncpa [#allocation9], 0 }
   0x3   :  { %13 = vsyncpa [#allocation4], 0  ;;  %s3440_s18 = smov [#allocation5]   ;;  %s3441_s20 = smov [#allocation2]  }
   0x4   :  { %s31_s19 = sshll.u32 %s3440_s18, 4  ;;  %s19_s21 = sshll.u32 %s3441_s20, 4  ;;  %s32_s19 = int_to_ptr.vmem [resolvable:$true] %s31_s19  ;;  %s3489_s21 = int_to_ptr.vmem [resolvable:$true] %s19_s21 }
   0x5   :  { %s3322_s24 = scalar_lea.hbm %s3941_s1, 512 }
   0x6   :  { %p3323_p0 = scmp.ne.s32.totalorder %s3941_s1, %s3322_s24  ;;  %p3326_p1 = scmp.lt.u32.totalorder %s3322_s24, %s3941_s1 }
   0x8   :  { %p3328_p2 = pnand %p3326_p1, %p3323_p0 }
   0xa   :  { %3331 = shalt.err (!%p3328_p2)
}
   0xb   :  { %s3332_s29 = scalar_lea.vmem %s32_s19, 512  ;;  %p3337_p4 = scmp.lt.s32.totalorder %s32_s19, %s32_s19 }
   0xc   :  { %p3333_p3 = scmp.ne.s32.totalorder %s32_s19, %s3332_s29  ;;  %p3338_p5 = scmp.lt.s32.totalorder %s3332_s29, %s3332_s29 }
   0xe   :  { %p3339_p6 = por %p3338_p5, %p3337_p4 }
  0x10   :  { %p3340_p7 = pnand %p3339_p6, %p3333_p3 }
  0x12   :  { %3343 = shalt.err (!%p3340_p7)
}
  0x13   :  { %s3442_s30 = smov 128   ;;  %s3443_s6 = smov 8  }
  0x14   :  { %37 = dma.hbm_to_vmem [thread:$0]  %s3941_s1, 512, %s32_s19, [#allocation6], %s3442_s30, %s3442_s30, %s3443_s6  }
  0x15   :  { %s3344_s11 = scalar_lea.hbm %s3940_s0, 256 }
  0x16   :  { %p3345_p8 = scmp.ne.s32.totalorder %s3940_s0, %s3344_s11  ;;  %p3348_p9 = scmp.lt.u32.totalorder %s3344_s11, %s3940_s0 }
  0x18   :  { %p3350_p10 = pnand %p3348_p9, %p3345_p8 }
  0x1a   :  { %3353 = shalt.err (!%p3350_p10)
}
  0x1b   :  { %s3354_s16 = scalar_lea.vmem %s3489_s21, 256  ;;  %p3359_p12 = scmp.lt.s32.totalorder %s3489_s21, %s3489_s21 }
  0x1c   :  { %p3355_p11 = scmp.ne.s32.totalorder %s3489_s21, %s3354_s16  ;;  %p3360_p13 = scmp.lt.s32.totalorder %s3354_s16, %s3354_s16 }
  0x1e   :  { %p3361_p0 = por %p3360_p13, %p3359_p12 }
  0x20   :  { %p3362_p1 = pnand %p3361_p0, %p3355_p11 }
  0x22   :  { %3365 = shalt.err (!%p3362_p1)
}
  0x23   :  { %25 = dma.hbm_to_vmem [thread:$0]  %s3940_s0, 256, %s3489_s21, [#allocation3], %s3442_s30, %s3442_s30, %s3443_s6  }
  0x24   :  { %s3444_s18 = smov [#allocation7]   ;;  %s3445_s20 = smov [#allocation8]  }
  0x25   :  { %s43_s19 = sshll.u32 %s3444_s18, 4  ;;  %s55_s22 = sshll.u32 %s3445_s20, 4  ;;  %s44_s19 = int_to_ptr.vmem [resolvable:$true] %s43_s19  ;;  %s3526_s22 = int_to_ptr.vmem [resolvable:$true] %s55_s22 }
  0x26   :  { %s3366_s25 = scalar_lea.hbm %s3942_s2, 256 }
  0x27   :  { %p3367_p2 = scmp.ne.s32.totalorder %s3942_s2, %s3366_s25  ;;  %p3370_p3 = scmp.lt.u32.totalorder %s3366_s25, %s3942_s2 }
  0x29   :  { %p3372_p4 = pnand %p3370_p3, %p3367_p2 }
  0x2b   :  { %3375 = shalt.err (!%p3372_p4)
}
  0x2c   :  { %s3376_s0 = scalar_lea.vmem %s44_s19, 256  ;;  %p3381_p6 = scmp.lt.s32.totalorder %s44_s19, %s44_s19 }
  0x2d   :  { %p3377_p5 = scmp.ne.s32.totalorder %s44_s19, %s3376_s0  ;;  %p3382_p7 = scmp.lt.s32.totalorder %s3376_s0, %s3376_s0 }
  0x2f   :  { %p3383_p8 = por %p3382_p7, %p3381_p6 }
  0x31   :  { %p3384_p9 = pnand %p3383_p8, %p3377_p5 }
  0x33   :  { %3387 = shalt.err (!%p3384_p9)
}
  0x34   :  { %49 = dma.hbm_to_vmem [thread:$0]  %s3942_s2, 256, %s44_s19, [#allocation6], %s3442_s30, %s3442_s30, %s3443_s6  }
  0x35   :  { %s3388_s10 = scalar_lea.hbm %s3943_s3, 8192 }
  0x36   :  { %p3389_p10 = scmp.ne.s32.totalorder %s3943_s3, %s3388_s10  ;;  %p3392_p11 = scmp.lt.u32.totalorder %s3388_s10, %s3943_s3 }
  0x38   :  { %p3394_p12 = pnand %p3392_p11, %p3389_p10 }
  0x3a   :  { %3397 = shalt.err (!%p3394_p12)
}
  0x3b   :  { %s3398_s15 = scalar_lea.vmem %s3526_s22, 8192  ;;  %p3403_p0 = scmp.lt.s32.totalorder %s3526_s22, %s3526_s22 }
  0x3c   :  { %p3399_p13 = scmp.ne.s32.totalorder %s3526_s22, %s3398_s15  ;;  %p3404_p1 = scmp.lt.s32.totalorder %s3398_s15, %s3398_s15 }
  0x3e   :  { %p3405_p2 = por %p3404_p1, %p3403_p0 }
  0x40   :  { %p3406_p3 = pnand %p3405_p2, %p3399_p13 }
  0x42   :  { %3409 = shalt.err (!%p3406_p3)
}
  0x43   :  { %s3446_s2 = smov 1024   ;;  %s3447_s16 = smov 64  }
  0x44   :  { %61 = dma.hbm_to_vmem [thread:$0]  %s3943_s3, 8192, %s3526_s22, [#allocation9], %s3446_s2, %s3446_s2, %s3447_s16  }
  0x45   :  { %3432 = dma.done.wait [#allocation3], 256  }
  0x46   :  { %3433 = vsyncadd [#allocation3], 4294967040 }
  0x47   :  { %3434 = dma.done.wait [#allocation6], 768  }
  0x48   :  { %3435 = vsyncadd [#allocation6], 4294966528 }
  0x49   :  { %3436 = dma.done.wait [#allocation9], 8192  }
  0x4a   :  { %3437 = vsyncadd [#allocation9], 4294959104  ;;  %vm83_vm0 = vcmask 261120   ;;  %v3561_v0 = vld [vmem:[#allocation5] sm:$0xff]  ;;  %v3563_v1 = vld [vmem:[#allocation5 + $0x8] sm:$0xff]  ;;  %s3448_s3 = smov 32  }
  0x4b   :  { %v3565_v2 = vld [vmem:[#allocation5 + $0x10] sm:$0xff]  ;;  %v3237_v3 = vpack.c.bf16 %v3563_v1, %v3561_v0  ;;  %v3569_v4 = vld [vmem:[#allocation5 + $0x18] sm:$0xff]  ;;  %v2985_v7 = vld [vmem:[#allocation7 + $0x1] ss:$0 sm:$0xff]  ;;  %v3449_v11 = vmov 0.0   ;;  %s3450_s18 = smov 120  }
  0x4c   :  { %v3571_v5 = vld [vmem:[#allocation2] sm:$0xff]  ;;  %v3241_v6 = vpack.c.bf16 %v3569_v4, %v3565_v2  ;;  %192 = vrot.lane.b32.xlu0 %v2985_v7, %s3448_s3  ;;  %v3578_v8 = vld [vmem:[#allocation2 + $0x8] sm:$0xff]  ;;  %3146 = vmatprep.subr.mxu1 %v3449_v11  ;;  %vm3451_vm1 = vmmov 0   ;;  %s3452_s19 = smov 112   ;;  %s3453_s20 = smov 104   ;;  %vm238_vm2 = vcmask 64512  }
  0x4d   :  { %3143 = vmatprep.mubr.msk.f32.mxu0 %vm83_vm0, %v3571_v5  ;;  %3238 = vmatprep.subr.bf16.mxu0 %v3237_v3  ;;  %v2984_v15 = vld [vmem:[#allocation7] ss:$0 sm:$0xff]  ;;  %s3454_s22 = smov 96   ;;  %v2986_v26 = vld [vmem:[#allocation7 + $0x2] ss:$0 sm:$0xff]  ;;  %s3455_s23 = smov 16  }
  0x4e   :  { %3240 = vmatpush3.bf16.msra.mxu0 %v3237_v3  ;;  %3148 = vmatprep.mubr.msk.f32.mxu1 %vm3451_vm1, %v3449_v11  ;;  %s3456_s24 = smov 24   ;;  %vm1567_vm3 = vcmask 130048   ;;  %vm1570_vm4 = vcmask 195584  }
  0x4f   :  { %3242 = vmatprep.subr.bf16.mxu0 %v3241_v6 }
  0x52   :  { %3244 = vmatpush3.bf16.msra.mxu0 %v3241_v6 }
  0x53   :  { %3166 = vmatprep.subr.mxu0 %v3449_v11 }
  0x55   :  { %3144 = vmatmul.mubr.msk.f32.vlgmr.msra.gmra.mrb[0].mxu0 %vm83_vm0, %v3578_v8 }
  0x56   :  { %3168 = vmatprep.mubr.msk.f32.mxu0 %vm3451_vm1, %v3449_v11 }
  0xbe   :  { %v193_v9 = vpop.permute.xlu0 %192 }
 0x128   :  { %v3582_v10 = vpop.f32.mrb[0].mxu0 }
 0x129   :  { %v196_v12 = vadd.f32 %v3582_v10, %v193_v9  ;;  %v3587_v13 = vpop.f32.mrb[1].mxu0  ;;  %v171_v16 = vadd.f32 %v3582_v10, %v2984_v15 }
 0x12a   :  { %v195_v14 = vadd.f32 %v193_v9, %v3587_v13  ;;  %v170_v17 = vadd.f32 %v2984_v15, %v3587_v13 }
 0x12b   :  { %201 = vrot.lane.b32.xlu1 %v196_v12, %s3450_s18 }
 0x12c   :  { %199 = vrot.lane.b32.xlu0 %v195_v14, %s3450_s18 }
 0x12f   :  { %203 = vrot.lane.b32.xlu1 %v195_v14, %s3452_s19 }
 0x130   :  { %205 = vrot.lane.b32.xlu0 %v196_v12, %s3452_s19 }
 0x133   :  { %207 = vrot.lane.b32.xlu1 %v195_v14, %s3453_s20 }
 0x134   :  { %209 = vrot.lane.b32.xlu0 %v196_v12, %s3453_s20 }
 0x137   :  { %236 = vrot.lane.b32.xlu1 %v195_v14, %s3454_s22 }
 0x138   :  { %313 = vrot.lane.b32.xlu0 %v196_v12, %s3454_s22 }
 0x13c   :  { %176 = vrot.lane.b32.xlu0 %v171_v16, %s3450_s18 }
 0x140   :  { %174 = vrot.lane.b32.xlu0 %v170_v17, %s3450_s18 }
 0x19d   :  { %v202_v18 = vpop.permute.xlu1 %201 }
 0x19e   :  { %465 = vrot.lane.b32.xlu1 %v202_v18, %s3454_s22  ;;  %v200_v19 = vpop.permute.xlu0 %199 }
 0x1a1   :  { %v204_v20 = vpop.permute.xlu1 %203 }
 0x1a2   :  { %389 = vrot.lane.b32.xlu1 %v200_v19, %s3454_s22  ;;  %v206_v21 = vpop.permute.xlu0 %205 }
 0x1a3   :  { %617 = vrot.lane.b32.xlu0 %v206_v21, %s3454_s22 }
 0x1a5   :  { %v208_v22 = vpop.permute.xlu1 %207 }
 0x1a6   :  { %178 = vrot.lane.b32.xlu1 %v170_v17, %s3452_s19  ;;  %v210_v23 = vpop.permute.xlu0 %209 }
 0x1a7   :  { %180 = vrot.lane.b32.xlu0 %v171_v16, %s3452_s19 }
 0x1a9   :  { %v237_v24 = vpop.permute.xlu1 %236 }
 0x1aa   :  { %3147 = vmatpush3.xpose.msk.msra.mxu1 %vm238_vm2, %v237_v24  ;;  %541 = vrot.lane.b32.xlu1 %v204_v20, %s3454_s22  ;;  %v314_v25 = vpop.permute.xlu0 %313 }
 0x1ab   :  { %769 = vrot.lane.b32.xlu0 %v210_v23, %s3454_s22  ;;  %3151 = vmatprep.subr.mxu1 %v3449_v11 }
 0x1ad   :  { %3149 = vmatmul.mubr.msk.f32.vlgmr.msra.gmra.mrb[0].mxu1 %vm238_vm2, %v170_v17 }
 0x1ae   :  { %693 = vrot.lane.b32.xlu1 %v208_v22, %s3454_s22  ;;  %3152 = vmatpush3.xpose.msk.msra.mxu1 %vm238_vm2, %v314_v25  ;;  %v177_v27 = vpop.permute.xlu0 %176 }
 0x1af   :  { %184 = vrot.lane.b32.xlu0 %v171_v16, %s3453_s20  ;;  %3153 = vmatprep.mubr.msk.f32.mxu1 %vm3451_vm1, %v3449_v11 }
 0x1b0   :  { %3156 = vmatprep.subr.mxu1 %v3449_v11 }
 0x1b1   :  { %3154 = vmatmul.mubr.msk.f32.vlgmr.msra.gmra.mrb[2].mxu1 %vm238_vm2, %v171_v16 }
 0x1b2   :  { %182 = vrot.lane.b32.xlu1 %v170_v17, %s3453_s20  ;;  %3158 = vmatprep.mubr.msk.f32.mxu1 %vm3451_vm1, %v3449_v11  ;;  %v175_v29 = vpop.permute.xlu0 %174 }
 0x1b6   :  { %217 = vrot.lane.b32.xlu1 %v2986_v26, %s3447_s16 }
 0x210   :  { %v466_v28 = vpop.permute.xlu1 %465 }
 0x214   :  { %v390_v30 = vpop.permute.xlu1 %389 }
 0x215   :  { %v618_v31 = vpop.permute.xlu0 %617  ;;  %3157 = vmatpush3.xpose.msk.msra.mxu1 %vm238_vm2, %v390_v30 }
 0x216   :  { %3161 = vmatprep.subr.mxu1 %v3449_v11 }
 0x218   :  { %v179_v32 = vpop.permute.xlu1 %178  ;;  %3159 = vmatmul.mubr.msk.f32.vlgmr.msra.gmra.mrb[4].mxu1 %vm238_vm2, %v175_v29 }
 0x219   :  { %v181_v33 = vpop.permute.xlu0 %180  ;;  %3162 = vmatpush3.xpose.msk.msra.mxu1 %vm238_vm2, %v466_v28  ;;  %3163 = vmatprep.mubr.msk.f32.mxu1 %vm3451_vm1, %v3449_v11 }
 0x21a   :  { %3171 = vmatprep.subr.mxu1 %v3449_v11 }
 0x21c   :  { %v542_v34 = vpop.permute.xlu1 %541  ;;  %3164 = vmatmul.mubr.msk.f32.vlgmr.msra.gmra.mrb[6].mxu1 %vm238_vm2, %v177_v27 }
 0x21d   :  { %3167 = vmatpush3.xpose.msk.msra.mxu0 %vm238_vm2, %v542_v34  ;;  %v770_v35 = vpop.permute.xlu0 %769  ;;  %3172 = vmatpush3.xpose.msk.msra.mxu1 %vm238_vm2, %v618_v31 }
 0x21e   :  { %3173 = vmatprep.mubr.msk.f32.mxu1 %vm3451_vm1, %v3449_v11  ;;  %3176 = vmatprep.subr.mxu0 %v3449_v11 }
 0x21f   :  { %3181 = vmatprep.subr.mxu1 %v3449_v11 }
 0x220   :  { %3169 = vmatmul.mubr.msk.f32.vlgmr.msra.gmra.mrb[2].mxu0 %vm238_vm2, %v179_v32  ;;  %v694_v36 = vpop.permute.xlu1 %693  ;;  %3174 = vmatmul.mubr.msk.f32.vlgmr.msra.gmra.mrb[8].mxu1 %vm238_vm2, %v181_v33 }
 0x221   :  { %3177 = vmatpush3.xpose.msk.msra.mxu0 %vm238_vm2, %v694_v36  ;;  %3182 = vmatpush3.xpose.msk.msra.mxu1 %vm238_vm2, %v770_v35  ;;  %v185_v37 = vpop.permute.xlu0 %184 }
 0x222   :  { %3183 = vmatprep.mubr.msk.f32.mxu1 %vm3451_vm1, %v3449_v11  ;;  %3178 = vmatprep.mubr.msk.f32.mxu0 %vm3451_vm1, %v3449_v11 }
 0x223   :  { %3191 = vmatprep.subr.mxu1 %v3449_v11  ;;  %3186 = vmatprep.subr.mxu0 %v3449_v11 }
 0x224   :  { %v183_v38 = vpop.permute.xlu1 %182  ;;  %3184 = vmatmul.mubr.msk.f32.vlgmr.msra.gmra.mrb[10].mxu1 %vm238_vm2, %v185_v37 }
 0x225   :  { %3179 = vmatmul.mubr.msk.f32.vlgmr.msra.gmra.mrb[4].mxu0 %vm238_vm2, %v183_v38  ;;  %3193 = vmatprep.mubr.msk.f32.mxu1 %vm3451_vm1, %v3449_v11 }
 0x226   :  { %3188 = vmatprep.mubr.msk.f32.mxu0 %vm3451_vm1, %v3449_v11 }
 0x228   :  { %v218_v63 = vpop.permute.xlu1 %217 }
 0x229   :  { %v220_v3 = vadd.f32 %v218_v63, %v3587_v13  ;;  %v221_v6 = vadd.f32 %v3582_v10, %v218_v63 }
 0x280   :  { %v3649_v39 = vpop.f32.mrb[0].mxu1 }
 0x281   :  { %v3150_v40 = vpop.f32.mrb[1].mxu1  ;;  %v845_v41 = vsel %vm238_vm2, %v3649_v39, -inf }
 0x282   :  { %846 = vmax.xlane.f32.xlu0 %v845_v41 }
 0x284   :  { %v3653_v42 = vpop.f32.mrb[2].mxu1 }
 0x285   :  { %v3155_v43 = vpop.f32.mrb[3].mxu1  ;;  %v848_v44 = vsel %vm238_vm2, %v3653_v42, -inf }
 0x286   :  { %849 = vmax.xlane.f32.xlu1 %v848_v44 }
 0x2eb   :  { %v3657_v45 = vpop.f32.mrb[4].mxu1 }
 0x2ec   :  { %v3160_v46 = vpop.f32.mrb[5].mxu1  ;;  %v851_v47 = vsel %vm238_vm2, %v3657_v45, -inf }
 0x2ed   :  { %852 = vmax.xlane.f32.xlu0 %v851_v47 }
 0x2ef   :  { %v3661_v48 = vpop.f32.mrb[6].mxu1 }
 0x2f0   :  { %v3165_v49 = vpop.f32.mrb[7].mxu1  ;;  %v854_v50 = vsel %vm238_vm2, %v3661_v48, -inf }
 0x2f1   :  { %855 = vmax.xlane.f32.xlu0 %v854_v50 }
 0x2f3   :  { %v3665_v51 = vpop.f32.mrb[2].mxu0  ;;  %v3667_v52 = vpop.f32.mrb[8].mxu1 }
 0x2f4   :  { %v3170_v53 = vpop.f32.mrb[3].mxu0  ;;  %v3175_v54 = vpop.f32.mrb[9].mxu1  ;;  %v857_v55 = vsel %vm238_vm2, %v3665_v51, -inf  ;;  %v860_v56 = vsel %vm238_vm2, %v3667_v52, -inf }
 0x2f5   :  { %858 = vmax.xlane.f32.xlu1 %v857_v55  ;;  %861 = vmax.xlane.f32.xlu0 %v860_v56 }
 0x2f7   :  { %v3673_v57 = vpop.f32.mrb[10].mxu1 }
 0x2f8   :  { %v3675_v58 = vpop.f32.mrb[4].mxu0  ;;  %v3185_v59 = vpop.f32.mrb[11].mxu1  ;;  %v866_v60 = vsel %vm238_vm2, %v3673_v57, -inf }
 0x2f9   :  { %v3180_v61 = vpop.f32.mrb[5].mxu0  ;;  %867 = vmax.xlane.f32.xlu0 %v866_v60  ;;  %v863_v62 = vsel %vm238_vm2, %v3675_v58, -inf }
 0x2fa   :  { %864 = vmax.xlane.f32.xlu1 %v863_v62 }
 0x30b   :  { %224 = vrot.lane.b32.xlu1 %v220_v3, %s3450_s18 }
 0x30f   :  { %228 = vrot.lane.b32.xlu1 %v220_v3, %s3452_s19  ;;  %226 = vrot.lane.b32.xlu0 %v221_v6, %s3450_s18  ;;  %v847_v7 = vpop.xlane.xlu0 %846 }
 0x310   :  { %v869_v24 = vsub.f32 %v3649_v39, %v847_v7 }
 0x312   :  { %v877_v26 = vmul.f32 1.442695, %v869_v24 }
 0x313   :  { %230 = vrot.lane.b32.xlu1 %v221_v6, %s3452_s19  ;;  %232 = vrot.lane.b32.xlu0 %v220_v3, %s3453_s20  ;;  %v850_v12 = vpop.xlane.xlu1 %849 }
 0x314   :  { %3282 = vpow2.f32 %v877_v26  ;;  %v870_v30 = vsub.f32 %v3653_v42, %v850_v12 }
 0x316   :  { %v879_v33 = vmul.f32 1.442695, %v870_v30  ;;  %v3272_v30 = vpack.i.bf16 %v3563_v1, %v3561_v0 }
 0x317   :  { %234 = vrot.lane.b32.xlu1 %v221_v6, %s3453_s20  ;;  %1009 = vrot.lane.b32.xlu0 %v221_v6, %s3447_s16 }
 0x31b   :  { %933 = vrot.lane.b32.xlu1 %v220_v3, %s3447_s16 }
 0x31e   :  { %v3283_v39 = vpop.eup %3282 }
 0x31f   :  { %v893_v42 = vsel %vm238_vm2, %v3283_v39, 0.0 }
 0x37a   :  { %v853_v9 = vpop.xlane.xlu0 %852 }
 0x37b   :  { %v871_v27 = vsub.f32 %v3657_v45, %v853_v9 }
 0x37d   :  { %v881_v28 = vmul.f32 1.442695, %v871_v27 }
 0x37e   :  { %v856_v13 = vpop.xlane.xlu0 %855 }
 0x37f   :  { %v872_v29 = vsub.f32 %v3661_v48, %v856_v13  ;;  %3284 = vpow2.f32 %v881_v28 }
 0x381   :  { %v883_v31 = vmul.f32 1.442695, %v872_v29 }
 0x382   :  { %v859_v14 = vpop.xlane.xlu1 %858  ;;  %v862_v10 = vpop.xlane.xlu0 %861 }
 0x383   :  { %v874_v32 = vsub.f32 %v3667_v52, %v862_v10  ;;  %v873_v34 = vsub.f32 %v3665_v51, %v859_v14  ;;  %3286 = vpow2.f32 %v883_v31  ;;  %v3277_v31 = vpack.i.bf16 %v3569_v4, %v3565_v2 }
 0x384   :  { %3288 = vpow2.f32 %v879_v33 }
 0x385   :  { %v887_v35 = vmul.f32 1.442695, %v874_v32  ;;  %v885_v37 = vmul.f32 1.442695, %v873_v34 }
 0x386   :  { %v868_v15 = vpop.xlane.xlu0 %867 }
 0x387   :  { %v865_v16 = vpop.xlane.xlu1 %864  ;;  %v876_v36 = vsub.f32 %v3673_v57, %v868_v15  ;;  %3290 = vpow2.f32 %v887_v35 }
 0x388   :  { %v875_v38 = vsub.f32 %v3675_v58, %v865_v16  ;;  %3292 = vpow2.f32 %v885_v37 }
 0x389   :  { %v891_v40 = vmul.f32 1.442695, %v876_v36  ;;  %v3285_v43 = vpop.eup %3284 }
 0x38a   :  { %v227_v17 = vpop.permute.xlu0 %226  ;;  %v889_v41 = vmul.f32 1.442695, %v875_v38  ;;  %v899_v44 = vsel %vm238_vm2, %v3285_v43, 0.0 }
 0x38b   :  { %v225_v18 = vpop.permute.xlu1 %224  ;;  %3294 = vpow2.f32 %v891_v40 }
 0x38c   :  { %1085 = vrot.lane.b32.xlu1 %v225_v18, %s3447_s16  ;;  %3296 = vpow2.f32 %v889_v41 }
 0x38d   :  { %v3287_v45 = vpop.eup %3286 }
 0x38e   :  { %v233_v19 = vpop.permute.xlu0 %232  ;;  %v3289_v46 = vpop.eup %3288  ;;  %v902_v47 = vsel %vm238_vm2, %v3287_v45, 0.0 }
 0x38f   :  { %v229_v20 = vpop.permute.xlu1 %228  ;;  %v896_v49 = vsel %vm238_vm2, %v3289_v46, 0.0 }
 0x390   :  { %1237 = vrot.lane.b32.xlu0 %v229_v20, %s3447_s16  ;;  %1161 = vrot.lane.b32.xlu1 %v227_v17, %s3447_s16 }
 0x391   :  { %v3708_v48 = vpop.eup %3290 }
 0x392   :  { %v1010_v21 = vpop.permute.xlu0 %1009  ;;  %v3293_v50 = vpop.eup %3292  ;;  %v908_v51 = vsel %vm238_vm2, %v3708_v48, 0.0 }
 0x393   :  { %v231_v22 = vpop.permute.xlu1 %230  ;;  %3192 = vmatpush3.msra.mxu1 %v1010_v21  ;;  %v905_v53 = vsel %vm238_vm2, %v3293_v50, 0.0 }
 0x394   :  { %1313 = vrot.lane.b32.xlu1 %v231_v22, %s3447_s16  ;;  %3201 = vmatprep.subr.mxu1 %v3449_v11 }
 0x395   :  { %v3713_v52 = vpop.eup %3294 }
 0x396   :  { %v3297_v54 = vpop.eup %3296  ;;  %v914_v55 = vsel %vm238_vm2, %v3713_v52, 0.0 }
 0x397   :  { %v235_v23 = vpop.permute.xlu1 %234  ;;  %v911_v56 = vsel %vm238_vm2, %v3297_v54, 0.0 }
 0x39b   :  { %v934_v25 = vpop.permute.xlu1 %933 }
 0x39c   :  { %3187 = vmatpush3.msra.mxu0 %v934_v25 }
 0x39d   :  { %3196 = vmatprep.subr.mxu0 %v3449_v11 }
 0x3af   :  { %894 = vadd.xlane.f32.xlu0 %v893_v42 }
 0x3b3   :  { %900 = vadd.xlane.f32.xlu0 %v899_v44 }
 0x3b7   :  { %903 = vadd.xlane.f32.xlu0 %v902_v47 }
 0x3b8   :  { %897 = vadd.xlane.f32.xlu1 %v896_v49 }
 0x3bb   :  { %909 = vadd.xlane.f32.xlu0 %v908_v51 }
 0x3bc   :  { %906 = vadd.xlane.f32.xlu1 %v905_v53 }
 0x3bf   :  { %915 = vadd.xlane.f32.xlu0 %v914_v55 }
 0x3c0   :  { %912 = vadd.xlane.f32.xlu1 %v911_v56 }
 0x3d1   :  { %1465 = vrot.lane.b32.xlu1 %v235_v23, %s3447_s16 }
 0x3d5   :  { %1389 = vrot.lane.b32.xlu0 %v233_v19, %s3447_s16  ;;  %3278 = vrot.lane.b32.xlu1 %v3277_v31, %s3448_s3  ;;  %v1739_v31 = vld [vmem:[#allocation8 + $0x80] sm:$0xff] }
 0x3d9   :  { %3273 = vrot.lane.b32.xlu0 %v3272_v30, %s3448_s3 }
 0x3fe   :  { %v1086_v57 = vpop.permute.xlu1 %1085 }
 0x402   :  { %v1238_v58 = vpop.permute.xlu0 %1237  ;;  %v1162_v59 = vpop.permute.xlu1 %1161 }
 0x406   :  { %v1314_v62 = vpop.permute.xlu1 %1313 }
 0x43c   :  { %v895_v60 = vpop.xlane.xlu0 %894 }
 0x43d   :  { %3298 = vrcp.f32 %v895_v60 }
 0x440   :  { %v901_v61 = vpop.xlane.xlu0 %900 }
 0x441   :  { %3300 = vrcp.f32 %v901_v61 }
 0x444   :  { %v904_v63 = vpop.xlane.xlu0 %903 }
 0x445   :  { %v898_v3 = vpop.xlane.xlu1 %897 }
 0x446   :  { %3302 = vrcp.f32 %v898_v3 }
 0x447   :  { %v3299_v6 = vpop.eup %3298  ;;  %3304 = vrcp.f32 %v904_v63  ;;  %v3011_v63 = vld [vmem:[#allocation7 + $0x3] ss:$0 sm:$0xff] }
 0x448   :  { %v925_v7 = vmul.f32 %v3299_v6, %v3283_v39  ;;  %v910_v9 = vpop.xlane.xlu0 %909 }
 0x449   :  { %v907_v12 = vpop.xlane.xlu1 %906 }
 0x44a   :  { %3306 = vrcp.f32 %v907_v12  ;;  %3189 = vmatmul.mubr.msk.f32.vlgmr.msra.gmra.mrb[6].mxu0 %vm238_vm2, %v925_v7 }
 0x44b   :  { %v3301_v13 = vpop.eup %3300  ;;  %3197 = vmatpush3.msra.mxu0 %v1086_v57  ;;  %3198 = vmatprep.mubr.msk.f32.mxu0 %vm3451_vm1, %v3449_v11  ;;  %3308 = vrcp.f32 %v910_v9 }
 0x44c   :  { %v927_v14 = vmul.f32 %v3301_v13, %v3285_v43  ;;  %3206 = vmatprep.subr.mxu0 %v3449_v11  ;;  %v916_v10 = vpop.xlane.xlu0 %915 }
 0x44d   :  { %v913_v15 = vpop.xlane.xlu1 %912 }
 0x44e   :  { %3310 = vrcp.f32 %v913_v15  ;;  %3199 = vmatmul.mubr.msk.f32.vlgmr.msra.gmra.mrb[8].mxu0 %vm238_vm2, %v927_v14 }
 0x44f   :  { %3207 = vmatpush3.msra.mxu0 %v1238_v58  ;;  %3208 = vmatprep.mubr.msk.f32.mxu0 %vm3451_vm1, %v3449_v11  ;;  %3312 = vrcp.f32 %v916_v10 }
 0x450   :  { %v3303_v16 = vpop.eup %3302  ;;  %3216 = vmatprep.subr.mxu0 %v3449_v11  ;;  %v1390_v23 = vpop.permute.xlu0 %1389 }
 0x451   :  { %v926_v17 = vmul.f32 %v3303_v16, %v3289_v46  ;;  %v3305_v18 = vpop.eup %3304  ;;  %v1466_v28 = vpop.permute.xlu1 %1465 }
 0x452   :  { %v928_v20 = vmul.f32 %v3305_v18, %v3287_v45 }
 0x453   :  { %3194 = vmatmul.mubr.msk.f32.vlgmr.msra.gmra.mrb[12].mxu1 %vm238_vm2, %v926_v17 }
 0x454   :  { %v3307_v19 = vpop.eup %3306  ;;  %3202 = vmatpush3.msra.mxu1 %v1162_v59  ;;  %3203 = vmatprep.mubr.msk.f32.mxu1 %vm3451_vm1, %v3449_v11  ;;  %v3274_v32 = vpop.permute.xlu0 %3273 }
 0x455   :  { %v929_v21 = vmul.f32 %v3307_v19, %v3293_v50  ;;  %3211 = vmatprep.subr.mxu1 %v3449_v11  ;;  %v3309_v22 = vpop.eup %3308  ;;  %v3276_v33 = vunpack.i.h.bf16 %v3274_v32  ;;  %v3275_v34 = vunpack.i.l.bf16 %v3274_v32  ;;  %v3279_v36 = vpop.permute.xlu1 %3278  ;;  %v1747_v32 = vld [vmem:[#allocation8 + $0xc0] sm:$0xff] }
 0x456   :  { %v930_v25 = vmul.f32 %v3309_v22, %v3708_v48  ;;  %v3280_v37 = vunpack.i.l.bf16 %v3279_v36 }
 0x457   :  { %3204 = vmatmul.mubr.msk.f32.vlgmr.msra.gmra.mrb[14].mxu1 %vm238_vm2, %v928_v20  ;;  %3209 = vmatmul.mubr.msk.f32.vlgmr.msra.gmra.mrb[10].mxu0 %vm238_vm2, %v929_v21  ;;  %v3245_v35 = vpack.c.bf16 %v3276_v33, %v3275_v34  ;;  %v1740_v33 = vld [vmem:[#allocation8 + $0x88] sm:$0xff]  ;;  %v3033_v34 = vcombine.high %v1739_v31, %v1747_v32 }
 0x458   :  { %v3311_v24 = vpop.eup %3310  ;;  %3212 = vmatpush3.msra.mxu1 %v1314_v62  ;;  %3217 = vmatpush3.msra.mxu0 %v1390_v23 }
 0x459   :  { %v931_v26 = vmul.f32 %v3311_v24, %v3297_v54  ;;  %3213 = vmatprep.mubr.msk.f32.mxu1 %vm3451_vm1, %v3449_v11  ;;  %3218 = vmatprep.mubr.msk.f32.mxu0 %vm3451_vm1, %v3449_v11  ;;  %v3313_v27 = vpop.eup %3312  ;;  %v1731_v24 = vld [vmem:[#allocation8 + $0x40] sm:$0xff] }
 0x45a   :  { %3221 = vmatprep.subr.mxu1 %v3449_v11  ;;  %v932_v29 = vmul.f32 %v3313_v27, %v3713_v52  ;;  %3246 = vmatprep.subr.bf16.mxu0 %v3245_v35  ;;  %v1732_v27 = vld [vmem:[#allocation8 + $0x48] sm:$0xff] }
 0x45b   :  { %3214 = vmatmul.mubr.msk.f32.vlgmr.msra.gmra.mrb[16].mxu1 %vm238_vm2, %v930_v25  ;;  %3219 = vmatmul.mubr.msk.f32.vlgmr.msra.gmra.mrb[12].mxu0 %vm238_vm2, %v931_v26  ;;  %v1724_v25 = vld [vmem:[#allocation8 + $0x8] sm:$0xff] }
 0x45c   :  { %3222 = vmatpush3.msra.mxu1 %v1466_v28  ;;  %3223 = vmatprep.mubr.msk.f32.mxu1 %vm3451_vm1, %v3449_v11  ;;  %v3281_v11 = vunpack.i.h.bf16 %v3279_v36  ;;  %v3019_v30 = vcombine.high %v1724_v25, %v1732_v27  ;;  %v3032_v36 = vcombine.low %v1739_v31, %v1747_v32  ;;  %v1745_v31 = vld [vmem:[#allocation8 + $0xb0] sm:$0xff] }
 0x45d   :  { %3248 = vmatpush3.bf16.msra.mxu0 %v3245_v35  ;;  %v1748_v35 = vld [vmem:[#allocation8 + $0xc8] sm:$0xff]  ;;  %v1753_v32 = vld [vmem:[#allocation8 + $0xf0] sm:$0xff] }
 0x45e   :  { %v3249_v38 = vpack.c.bf16 %v3281_v11, %v3280_v37  ;;  %v3034_v11 = vcombine.low %v1740_v33, %v1748_v35  ;;  %v3035_v37 = vcombine.high %v1740_v33, %v1748_v35  ;;  %v1746_v33 = vld [vmem:[#allocation8 + $0xb8] sm:$0xff] }
 0x45f   :  { %3224 = vmatmul.mubr.msk.f32.vlgmr.msra.gmra.mrb[18].mxu1 %vm238_vm2, %v932_v29  ;;  %v3018_v29 = vcombine.low %v1724_v25, %v1732_v27  ;;  %v1730_v25 = vld [vmem:[#allocation8 + $0x38] sm:$0xff] }
 0x460   :  { %3250 = vmatprep.subr.bf16.mxu0 %v3249_v38 }
 0x461   :  { %3252 = vmatpush3.bf16.msra.mxu0 %v3249_v38  ;;  %v1725_v38 = vld [vmem:[#allocation8 + $0x10] sm:$0xff] }
 0x462   :  { %2045 = vmatprep.subr.bf16.mxu0 %v3019_v30 }
 0x51d   :  { %v1005_v0 = vpop.f32.mrb[6].mxu0 }
 0x51e   :  { %v3190_v1 = vpop.f32.mrb[7].mxu0 }
 0x51f   :  { %v1726_v1 = vld [vmem:[#allocation8 + $0x18] sm:$0xff] }
 0x521   :  { %v1157_v39 = vpop.f32.mrb[8].mxu0 }
 0x522   :  { %1543 = vrot.lane.b32.xlu0 %v1157_v39, %s3443_s6  ;;  %v3200_v2 = vpop.f32.mrb[9].mxu0  ;;  %v3457_v39 = vmov 0  }
 0x523   :  { %2034 = vmatprep.mubr.bf16.mxu1 %v3457_v39 }
 0x526   :  { %v1081_v4 = vpop.f32.mrb[12].mxu1 }
 0x527   :  { %v3195_v40 = vpop.f32.mrb[13].mxu1 }
 0x52a   :  { %v1233_v41 = vpop.f32.mrb[14].mxu1  ;;  %v1309_v42 = vpop.f32.mrb[10].mxu0 }
 0x52b   :  { %1551 = vrot.lane.b32.xlu0 %v1309_v42, %s3455_s23  ;;  %v3210_v43 = vpop.f32.mrb[11].mxu0  ;;  %1545 = vrot.lane.b32.xlu1 %v1233_v41, %s3443_s6  ;;  %v3205_v44 = vpop.f32.mrb[15].mxu1 }
 0x52e   :  { %v1385_v45 = vpop.f32.mrb[16].mxu1  ;;  %v1461_v46 = vpop.f32.mrb[12].mxu0 }
 0x52f   :  { %1559 = vrot.lane.b32.xlu0 %v1461_v46, %s3456_s24  ;;  %v3220_v47 = vpop.f32.mrb[13].mxu0  ;;  %1553 = vrot.lane.b32.xlu1 %v1385_v45, %s3455_s23  ;;  %v3215_v48 = vpop.f32.mrb[17].mxu1 }
 0x532   :  { %v1537_v49 = vpop.f32.mrb[18].mxu1 }
 0x533   :  { %1561 = vrot.lane.b32.xlu1 %v1537_v49, %s3456_s24  ;;  %v3225_v50 = vpop.f32.mrb[19].mxu1 }
 0x594   :  { %v1544_v51 = vpop.permute.xlu0 %1543 }
 0x595   :  { %v1565_v54 = vsel %vm238_vm2, %v1005_v0, %v1544_v51  ;;  %v1733_v0 = vld [vmem:[#allocation8 + $0x50] sm:$0xff] }
 0x596   :  { %v3021_v2 = vcombine.high %v1725_v38, %v1733_v0  ;;  %v3020_v40 = vcombine.low %v1725_v38, %v1733_v0  ;;  %v3014_v51 = vld [vmem:[#allocation7 + $0x4] ss:$0 sm:$0xff]  ;;  %v2394_v38 = vld [vmem:[#allocation8 + $0x100] sm:$0xff] }
 0x597   :  { %v2402_v0 = vld [vmem:[#allocation8 + $0x140] sm:$0xff] }
 0x59d   :  { %v1552_v52 = vpop.permute.xlu0 %1551  ;;  %v1546_v53 = vpop.permute.xlu1 %1545 }
 0x59e   :  { %v1568_v55 = vsel %vm1567_vm3, %v1565_v54, %v1552_v52  ;;  %v1566_v59 = vsel %vm238_vm2, %v1081_v4, %v1546_v53  ;;  %v1734_v4 = vld [vmem:[#allocation8 + $0x58] sm:$0xff] }
 0x59f   :  { %v3022_v41 = vcombine.low %v1726_v1, %v1734_v4  ;;  %v3023_v42 = vcombine.high %v1726_v1, %v1734_v4  ;;  %v2395_v1 = vld [vmem:[#allocation8 + $0x108] sm:$0xff]  ;;  %v3044_v4 = vcombine.low %v1745_v31, %v1753_v32 }
 0x5a1   :  { %v1560_v56 = vpop.permute.xlu0 %1559  ;;  %v1554_v57 = vpop.permute.xlu1 %1553 }
 0x5a2   :  { %v1571_v58 = vsel %vm1570_vm4, %v1568_v55, %v1560_v56  ;;  %v1569_v60 = vsel %vm1567_vm3, %v1566_v59, %v1554_v57  ;;  %v3015_v55 = vld [vmem:[#allocation7 + $0x5] ss:$0 sm:$0xff]  ;;  %v1742_v59 = vld [vmem:[#allocation8 + $0x98] sm:$0xff] }
 0x5a3   :  { %3234 = vmatprep.mubr.msk.f32.mxu0 %vm83_vm0, %v1571_v58  ;;  %v1741_v57 = vld [vmem:[#allocation8 + $0x90] sm:$0xff] }
 0x5a4   :  { %v1749_v58 = vld [vmem:[#allocation8 + $0xd0] sm:$0xff] }
 0x5a5   :  { %v1562_v61 = vpop.permute.xlu1 %1561 }
 0x5a6   :  { %v1572_v62 = vsel %vm1570_vm4, %v1569_v60, %v1562_v61  ;;  %v1750_v60 = vld [vmem:[#allocation8 + $0xd8] sm:$0xff] }
 0x5a7   :  { %3235 = vmatmul.mubr.msk.f32.vlgmr.msra.gmra.mrb[14].mxu0 %vm83_vm0, %v1572_v62 }
 0x5a8   :  { %2046 = vmatpush1.bf16.msra.mxu0 %v3018_v29  ;;  %2077 = vmatprep.mubr.bf16.mxu0 %v3457_v39 }
 0x5a9   :  { %2047 = vmatprep.subr.bf16.mxu0 %v3035_v37 }
 0x5ac   :  { %2048 = vmatpush1.bf16.msra.mxu0 %v3034_v11  ;;  %v3045_v11 = vcombine.high %v1745_v31, %v1753_v32 }
 0x5ad   :  { %2131 = vmatprep.subr.bf16.mxu0 %v3023_v42 }
 0x67a   :  { %v3236_v3 = vpop.f32.mrb[14].mxu0 }
 0x67b   :  { %v1676_v6 = vadd.f32 %v3236_v3, %v3011_v63  ;;  %v1670_v7 = vpop.f32.mrb[15].mxu0  ;;  %v3037_v3 = vcombine.high %v1741_v57, %v1749_v58 }
 0x67c   :  { %v1671_v9 = vadd.f32 %v3011_v63, %v1670_v7  ;;  %v1727_v7 = vld [vmem:[#allocation8 + $0x20] sm:$0xff] }
 0x67d   :  { %v1680_v12 = vadd.f32 %v1676_v6, %v3578_v8  ;;  %v3039_v6 = vcombine.high %v1742_v59, %v1750_v60 }
 0x67e   :  { %v1679_v13 = vadd.f32 %v1671_v9, %v3571_v5  ;;  %v1723_v5 = vld [vmem:[#allocation8] sm:$0xff] }
 0x67f   :  { %v1686_v14 = vsel %vm83_vm0, %v1680_v12, 0.0  ;;  %v3017_v26 = vcombine.high %v1723_v5, %v1731_v24  ;;  %v3016_v28 = vcombine.low %v1723_v5, %v1731_v24  ;;  %v1735_v9 = vld [vmem:[#allocation8 + $0x60] sm:$0xff]  ;;  %v1729_v5 = vld [vmem:[#allocation8 + $0x30] sm:$0xff] }
 0x680   :  { %1687 = vadd.xlane.f32.xlu1 %v1686_v14  ;;  %v1683_v10 = vsel %vm83_vm0, %v1679_v13, 0.0  ;;  %v3036_v14 = vcombine.low %v1741_v57, %v1749_v58  ;;  %v1737_v24 = vld [vmem:[#allocation8 + $0x70] sm:$0xff] }
 0x681   :  { %1684 = vadd.xlane.f32.xlu0 %v1683_v10  ;;  %2002 = vmatprep.subr.bf16.mxu1 %v3017_v26  ;;  %v3038_v10 = vcombine.low %v1742_v59, %v1750_v60  ;;  %v1738_v26 = vld [vmem:[#allocation8 + $0x78] sm:$0xff]  ;;  %v3029_v29 = vcombine.high %v1729_v5, %v1737_v24  ;;  %v3028_v35 = vcombine.low %v1729_v5, %v1737_v24  ;;  %v1759_v60 = vlaneseq }
 0x682   :  { %2003 = vmatpush1.bf16.msra.mxu1 %v3016_v28  ;;  %v3031_v30 = vcombine.high %v1730_v25, %v1738_v26 }
 0x683   :  { %2004 = vmatprep.subr.bf16.mxu1 %v3033_v34  ;;  %v1754_v34 = vld [vmem:[#allocation8 + $0xf8] sm:$0xff] }
 0x684   :  { %v3047_v37 = vcombine.high %v1746_v33, %v1754_v34 }
 0x686   :  { %2005 = vmatpush1.bf16.msra.mxu1 %v3032_v36  ;;  %v3030_v36 = vcombine.low %v1730_v25, %v1738_v26 }
 0x687   :  { %2088 = vmatprep.subr.bf16.mxu1 %v3021_v2  ;;  %v2403_v2 = vld [vmem:[#allocation8 + $0x148] sm:$0xff] }
 0x688   :  { %v3060_v42 = vcombine.high %v2395_v1, %v2403_v2 }
 0x70d   :  { %v1688_v15 = vpop.xlane.xlu1 %1687 }
 0x70e   :  { %v1691_v16 = vmul.f32 0.03125, %v1688_v15  ;;  %v1685_v17 = vpop.xlane.xlu0 %1684  ;;  %v3025_v15 = vcombine.high %v1727_v7, %v1735_v9 }
 0x70f   :  { %v1690_v18 = vmul.f32 0.03125, %v1685_v17  ;;  %v1743_v17 = vld [vmem:[#allocation8 + $0xa0] sm:$0xff] }
 0x710   :  { %v1693_v19 = vsub.f32 %v1680_v12, %v1691_v16  ;;  %v1728_v12 = vld [vmem:[#allocation8 + $0x28] sm:$0xff] }
 0x711   :  { %v1692_v20 = vsub.f32 %v1679_v13, %v1690_v18  ;;  %v1736_v13 = vld [vmem:[#allocation8 + $0x68] sm:$0xff]  ;;  %v1751_v18 = vld [vmem:[#allocation8 + $0xe0] sm:$0xff] }
 0x712   :  { %v1695_v23 = vmul.f32 %v1693_v19, %v1693_v19  ;;  %v3027_v16 = vcombine.high %v1728_v12, %v1736_v13  ;;  %v3040_v27 = vcombine.low %v1743_v17, %v1751_v18 }
 0x713   :  { %v1694_v21 = vmul.f32 %v1692_v20, %v1692_v20 }
 0x714   :  { %v1699_v8 = vsel %vm83_vm0, %v1695_v23, 0.0  ;;  %v3041_v23 = vcombine.high %v1743_v17, %v1751_v18 }
 0x715   :  { %v1696_v22 = vsel %vm83_vm0, %v1694_v21, 0.0  ;;  %v3024_v21 = vcombine.low %v1727_v7, %v1735_v9  ;;  %v1755_v7 = vld [vmem:[%s3944_s4] sm:$0xff] }
 0x716   :  { %1697 = vadd.xlane.f32.xlu0 %v1696_v22  ;;  %v3026_v22 = vcombine.low %v1728_v12, %v1736_v13 }
 0x71a   :  { %1700 = vadd.xlane.f32.xlu0 %v1699_v8 }
 0x7a3   :  { %v1698_v43 = vpop.xlane.xlu0 %1697 }
 0x7a4   :  { %v1702_v44 = vmul.f32 0.03125, %v1698_v43  ;;  %v3057_v43 = vcombine.low %v2394_v38, %v2402_v0 }
 0x7a6   :  { %v1704_v45 = vadd.f32 1e-05, %v1702_v44  ;;  %v3059_v44 = vcombine.low %v2395_v1, %v2403_v2 }
 0x7a7   :  { %v1701_v46 = vpop.xlane.xlu0 %1700 }
 0x7a8   :  { %3314 = vrsqrt.f32 %v1704_v45  ;;  %v1703_v47 = vmul.f32 0.03125, %v1701_v46  ;;  %v2410_v45 = vld [vmem:[#allocation8 + $0x180] sm:$0xff] }
 0x7a9   :  { %v2418_v46 = vld [vmem:[#allocation8 + $0x1c0] sm:$0xff] }
 0x7aa   :  { %v1705_v48 = vadd.f32 1e-05, %v1703_v47  ;;  %v2411_v47 = vld [vmem:[#allocation8 + $0x188] sm:$0xff] }
 0x7ac   :  { %3316 = vrsqrt.f32 %v1705_v48  ;;  %v3074_v48 = vcombine.high %v2410_v45, %v2418_v46 }
 0x7b2   :  { %v3315_v49 = vpop.eup %3314 }
 0x7b3   :  { %v1708_v50 = vmul.f32 %v3315_v49, %v1692_v20  ;;  %v1752_v20 = vld [vmem:[#allocation8 + $0xe8] sm:$0xff] }
 0x7b4   :  { %v2419_v49 = vld [vmem:[#allocation8 + $0x1c8] sm:$0xff] }
 0x7b5   :  { %v1714_v53 = vmul.f32 %v3014_v51, %v1708_v50  ;;  %v3075_v50 = vcombine.low %v2411_v47, %v2419_v49 }
 0x7b6   :  { %v3317_v52 = vpop.eup %3316 }
 0x7b7   :  { %v1709_v54 = vmul.f32 %v3317_v52, %v1693_v19  ;;  %v3767_v61 = vadd.f32 %v3015_v55, %v1714_v53  ;;  %v1744_v19 = vld [vmem:[#allocation8 + $0xa8] sm:$0xff]  ;;  %v3797_v52 = vld [vmem:[#allocation8 + $0x110] sm:$0xff] }
 0x7b8   :  { %v3043_v8 = vcombine.high %v1744_v19, %v1752_v20  ;;  %v3042_v28 = vcombine.low %v1744_v19, %v1752_v20  ;;  %v3799_v53 = vld [vmem:[#allocation8 + $0x150] sm:$0xff] }
 0x7b9   :  { %v1715_v56 = vmul.f32 %v3014_v51, %v1709_v54  ;;  %v3076_v51 = vcombine.high %v2411_v47, %v2419_v49  ;;  %v3801_v54 = vld [vmem:[#allocation8 + $0x118] sm:$0xff]  ;;  %v3061_v57 = vcombine.low %v3797_v52, %v3799_v53 }
 0x7bb   :  { %v3769_v62 = vadd.f32 %v3015_v55, %v1715_v56  ;;  %v3062_v55 = vcombine.high %v3797_v52, %v3799_v53  ;;  %v3805_v56 = vld [vmem:[#allocation8 + $0x158] sm:$0xff] }
 0x7bc   :  { %v3063_v58 = vcombine.low %v3801_v54, %v3805_v56  ;;  %v3064_v59 = vcombine.high %v3801_v54, %v3805_v56  ;;  %v3877_v54 = vld [vmem:[#allocation8 + $0x128] sm:$0xff] }
 0x7bd   :  { %v3773_v63 = vpack.c.bf16 %v3769_v62, %v3767_v61  ;;  %v3879_v56 = vld [vmem:[#allocation8 + $0x168] sm:$0xff] }
 0x7bf   :  { %3048 = vmatmul.mubr.msk.bf16.vlgmr.msra.gmra.mrb[20].mxu1 %vm83_vm0, %v3773_v63  ;;  %3049 = vmatmul.mubr.msk.bf16.vlgmr.msra.gmra.mrb[16].mxu0 %vm83_vm0, %v3773_v63 }
 0x7c0   :  { %2089 = vmatpush1.bf16.msra.mxu1 %v3020_v40  ;;  %2132 = vmatpush1.bf16.msra.mxu0 %v3022_v41  ;;  %v3046_v40 = vcombine.low %v1746_v33, %v1754_v34  ;;  %v3058_v41 = vcombine.high %v2394_v38, %v2402_v0 }
 0x7c1   :  { %2090 = vmatprep.subr.bf16.mxu1 %v3037_v3  ;;  %2133 = vmatprep.subr.bf16.mxu0 %v3039_v6 }
 0x7c2   :  { %2120 = vmatprep.mubr.bf16.mxu1 %v3457_v39  ;;  %2163 = vmatprep.mubr.bf16.mxu0 %v3457_v39 }
 0x7c4   :  { %2091 = vmatpush1.bf16.msra.mxu1 %v3036_v14  ;;  %2134 = vmatpush1.bf16.msra.mxu0 %v3038_v10 }
 0x7c5   :  { %2174 = vmatprep.subr.bf16.mxu1 %v3025_v15  ;;  %2217 = vmatprep.subr.bf16.mxu0 %v3027_v16 }
 0x7c7   :  { %3050 = vmatmul.mubr.msk.bf16.vlgmr.msra.gmra.mrb[24].mxu1 %vm83_vm0, %v3773_v63  ;;  %3051 = vmatmul.mubr.msk.bf16.vlgmr.msra.gmra.mrb[20].mxu0 %vm83_vm0, %v3773_v63 }
 0x7c8   :  { %2175 = vmatpush1.bf16.msra.mxu1 %v3024_v21  ;;  %2218 = vmatpush1.bf16.msra.mxu0 %v3026_v22 }
 0x7c9   :  { %2176 = vmatprep.subr.bf16.mxu1 %v3041_v23  ;;  %2219 = vmatprep.subr.bf16.mxu0 %v3043_v8 }
 0x7ca   :  { %2206 = vmatprep.mubr.bf16.mxu1 %v3457_v39  ;;  %2249 = vmatprep.mubr.bf16.mxu0 %v3457_v39 }
 0x7cc   :  { %2177 = vmatpush1.bf16.msra.mxu1 %v3040_v27  ;;  %2220 = vmatpush1.bf16.msra.mxu0 %v3042_v28 }
 0x7cd   :  { %2260 = vmatprep.subr.bf16.mxu1 %v3029_v29  ;;  %2303 = vmatprep.subr.bf16.mxu0 %v3031_v30 }
 0x7cf   :  { %3052 = vmatmul.mubr.msk.bf16.vlgmr.msra.gmra.mrb[28].mxu1 %vm83_vm0, %v3773_v63  ;;  %3053 = vmatmul.mubr.msk.bf16.vlgmr.msra.gmra.mrb[24].mxu0 %vm83_vm0, %v3773_v63 }
 0x7d0   :  { %2261 = vmatpush1.bf16.msra.mxu1 %v3028_v35  ;;  %2304 = vmatpush1.bf16.msra.mxu0 %v3030_v36 }
 0x7d1   :  { %2262 = vmatprep.subr.bf16.mxu1 %v3045_v11  ;;  %2305 = vmatprep.subr.bf16.mxu0 %v3047_v37  ;;  %v3843_v37 = vld [vmem:[%s3944_s4 + $0x8] sm:$0xff]  ;;  %s3458_s4 = smov [#allocation10]  }
 0x7d2   :  { %2292 = vmatprep.mubr.bf16.mxu1 %v3457_v39  ;;  %2335 = vmatprep.mubr.bf16.mxu0 %v3457_v39  ;;  %v3073_v39 = vcombine.low %v2410_v45, %v2418_v46  ;;  %v3849_v45 = vld [vmem:[#allocation8 + $0x198] sm:$0xff]  ;;  %s2968_s29 = sshll.u32 %s3458_s4, 4  ;;  %s2969_s29 = int_to_ptr.vmem [resolvable:$true] %s2968_s29 }
 0x7d3   :  { %v3851_v46 = vld [vmem:[#allocation8 + $0x1d8] sm:$0xff]  ;;  %s3410_s0 = scalar_lea.vmem %s2969_s29, 256  ;;  %p3415_p5 = scmp.lt.s32.totalorder %s2969_s29, %s2969_s29 }
 0x7d4   :  { %2263 = vmatpush1.bf16.msra.mxu1 %v3044_v4  ;;  %2306 = vmatpush1.bf16.msra.mxu0 %v3046_v40  ;;  %v3845_v4 = vld [vmem:[#allocation8 + $0x190] sm:$0xff]  ;;  %p3411_p4 = scmp.ne.s32.totalorder %s2969_s29, %s3410_s0  ;;  %p3416_p6 = scmp.lt.s32.totalorder %s3410_s0, %s3410_s0 }
 0x7d5   :  { %2591 = vmatprep.subr.bf16.mxu1 %v3058_v41  ;;  %2632 = vmatprep.subr.bf16.mxu0 %v3060_v42  ;;  %v3847_v40 = vld [vmem:[#allocation8 + $0x1d0] sm:$0xff] }
 0x7d6   :  { %p3417_p7 = por %p3416_p6, %p3415_p5 }
 0x7d7   :  { %3054 = vmatmul.mubr.msk.bf16.vlgmr.msra.gmra.mrb[32].mxu1 %vm83_vm0, %v3773_v63  ;;  %3055 = vmatmul.mubr.msk.bf16.vlgmr.msra.gmra.mrb[28].mxu0 %vm83_vm0, %v3773_v63  ;;  %v3813_v63 = vshrl.u32 %v1759_v60, 7 }
 0x7d8   :  { %p3418_p8 = pnand %p3417_p7, %p3411_p4 }
 0x7d9   :  { %v1761_v3 = vsub.s32 0, %v3813_v63  ;;  %v1769_v6 = vsub.s32 2, %v3813_v63  ;;  %v1765_v9 = vsub.s32 1, %v3813_v63  ;;  %v1773_v12 = vsub.s32 3, %v3813_v63 }
 0x7da   :  { %v1777_v16 = vsub.s32 4, %v3813_v63  ;;  %v1785_v17 = vsub.s32 6, %v3813_v63  ;;  %v1781_v20 = vsub.s32 5, %v3813_v63  ;;  %v1789_v21 = vsub.s32 7, %v3813_v63  ;;  %v2423_v63 = vld [vmem:[#allocation8 + $0x1e8] sm:$0xff] }
 0x7db   :  { %v1762_v13 = vrot.slane %v1755_v7, %v1761_v3  ;;  %v1770_v14 = vrot.slane %v1755_v7, %v1769_v6  ;;  %v1766_v10 = vrot.slane %v1755_v7, %v1765_v9  ;;  %v1774_v15 = vrot.slane %v1755_v7, %v1773_v12 }
 0x7dc   :  { %v1778_v32 = vrot.slane %v1755_v7, %v1777_v16  ;;  %v1786_v33 = vrot.slane %v1755_v7, %v1785_v17  ;;  %v1782_v36 = vrot.slane %v1755_v7, %v1781_v20  ;;  %v1790_v11 = vrot.slane %v1755_v7, %v1789_v21 }
 0x7dd   :  { %2592 = vmatpush1.bf16.xpose.msra.mxu1 %v3057_v43  ;;  %2633 = vmatpush1.bf16.xpose.msra.mxu0 %v3059_v44 }
 0x7de   :  { %2593 = vmatprep.subr.bf16.mxu1 %v3074_v48  ;;  %2634 = vmatprep.subr.bf16.mxu0 %v3076_v51 }
 0x7e5   :  { %2594 = vmatpush1.bf16.xpose.msra.mxu1 %v3073_v39  ;;  %2635 = vmatpush1.bf16.xpose.msra.mxu0 %v3075_v50 }
 0x7e6   :  { %2673 = vmatprep.subr.bf16.mxu1 %v3062_v55  ;;  %2714 = vmatprep.subr.bf16.mxu0 %v3064_v59  ;;  %v1794_v55 = vrot.slane %v3843_v37, %v1761_v3  ;;  %v1802_v3 = vrot.slane %v3843_v37, %v1769_v6  ;;  %v1806_v6 = vrot.slane %v3843_v37, %v1773_v12 }
 0x892   :  { %v2036_v18 = vpop.f32.mrb[20].mxu1  ;;  %v2079_v19 = vpop.f32.mrb[16].mxu0 }
 0x893   :  { %v2037_v22 = vadd.f32 %v2036_v18, %v1762_v13  ;;  %v2080_v23 = vadd.f32 %v2079_v19, %v1770_v14  ;;  %v2038_v8 = vpop.f32.mrb[21].mxu1  ;;  %v2081_v5 = vpop.f32.mrb[17].mxu0 }
 0x894   :  { %v2039_v24 = vadd.f32 %v2038_v8, %v1766_v10  ;;  %v2082_v25 = vadd.f32 %v2081_v5, %v1774_v15  ;;  %v2040_v26 = vpop.f32.mrb[22].mxu1  ;;  %v2083_v27 = vpop.f32.mrb[18].mxu0 }
 0x895   :  { %v2041_v28 = vadd.f32 %v2040_v26, %v1762_v13  ;;  %v2084_v29 = vadd.f32 %v2083_v27, %v1770_v14  ;;  %v2042_v30 = vpop.f32.mrb[23].mxu1  ;;  %v2085_v31 = vpop.f32.mrb[19].mxu0  ;;  %v2346_v38 = vmax.f32 %v2037_v22, 0.0  ;;  %v2348_v0 = vmax.f32 %v2080_v23, 0.0 }
 0x896   :  { %v2043_v34 = vadd.f32 %v2042_v30, %v1766_v10  ;;  %v2086_v35 = vadd.f32 %v2085_v31, %v1774_v15  ;;  %v2347_v41 = vmax.f32 %v2039_v24, 0.0  ;;  %v2349_v42 = vmax.f32 %v2082_v25, 0.0 }
 0x897   :  { %v2362_v1 = vmax.f32 %v2041_v28, 0.0  ;;  %v2364_v2 = vmax.f32 %v2084_v29, 0.0  ;;  %v3078_v14 = vcombine.high %v3845_v4, %v3847_v40  ;;  %v3080_v10 = vcombine.high %v3849_v45, %v3851_v46 }
 0x898   :  { %v2363_v43 = vmax.f32 %v2043_v34, 0.0  ;;  %v2365_v44 = vmax.f32 %v2086_v35, 0.0  ;;  %v1798_v25 = vrot.slane %v3843_v37, %v1765_v9  ;;  %v3873_v9 = vld [vmem:[#allocation8 + $0x120] sm:$0xff] }
 0x899   :  { %v2378_v47 = vpack.c.bf16 %v2362_v1, %v2346_v38  ;;  %v2380_v48 = vpack.c.bf16 %v2364_v2, %v2348_v0  ;;  %v3077_v38 = vcombine.low %v3845_v4, %v3847_v40  ;;  %v3079_v0 = vcombine.low %v3849_v45, %v3851_v46 }
 0x89a   :  { %v2379_v49 = vpack.c.bf16 %v2363_v43, %v2347_v41  ;;  %v2381_v39 = vpack.c.bf16 %v2365_v44, %v2349_v42  ;;  %v2122_v50 = vpop.f32.mrb[24].mxu1  ;;  %v2165_v51 = vpop.f32.mrb[20].mxu0  ;;  %v3068_v44 = vcombine.high %v3877_v54, %v3879_v56  ;;  %v1810_v4 = vrot.slane %v3843_v37, %v1777_v16 }
 0x89b   :  { %v2123_v59 = vadd.f32 %v2122_v50, %v1778_v32  ;;  %v2166_v60 = vadd.f32 %v2165_v51, %v1786_v33  ;;  %v2124_v7 = vpop.f32.mrb[25].mxu1  ;;  %v2167_v13 = vpop.f32.mrb[21].mxu0  ;;  %v1818_v51 = vrot.slane %v3843_v37, %v1785_v17  ;;  %v1822_v16 = vrot.slane %v3843_v37, %v1789_v21 }
 0x89c   :  { %v2125_v15 = vadd.f32 %v2124_v7, %v1782_v36  ;;  %v2168_v18 = vadd.f32 %v2167_v13, %v1790_v11  ;;  %v2126_v19 = vpop.f32.mrb[26].mxu1  ;;  %v2169_v22 = vpop.f32.mrb[22].mxu0  ;;  %2623 = vmatprep.mubr.bf16.mxu1 %v2379_v49  ;;  %2664 = vmatprep.mubr.bf16.mxu0 %v2381_v39 }
 0x89d   :  { %v2127_v23 = vadd.f32 %v2126_v19, %v1778_v32  ;;  %v2170_v8 = vadd.f32 %v2169_v22, %v1786_v33  ;;  %v2128_v5 = vpop.f32.mrb[27].mxu1  ;;  %v2171_v24 = vpop.f32.mrb[23].mxu0  ;;  %2624 = vmatmul.mubr.bf16.vlgmr.msra.gmra.mrb[36].mxu1 %v2378_v47  ;;  %2665 = vmatmul.mubr.bf16.vlgmr.msra.gmra.mrb[32].mxu0 %v2380_v48  ;;  %v2350_v28 = vmax.f32 %v2123_v59, 0.0  ;;  %v2352_v29 = vmax.f32 %v2166_v60, 0.0  ;;  %v3875_v32 = vld [vmem:[#allocation8 + $0x160] sm:$0xff] }
 0x89e   :  { %v2129_v26 = vadd.f32 %v2128_v5, %v1782_v36  ;;  %v2172_v27 = vadd.f32 %v2171_v24, %v1790_v11  ;;  %2674 = vmatpush1.bf16.xpose.msra.mxu1 %v3061_v57  ;;  %2715 = vmatpush1.bf16.xpose.msra.mxu0 %v3063_v58  ;;  %v2351_v52 = vmax.f32 %v2125_v15, 0.0  ;;  %v2353_v53 = vmax.f32 %v2168_v18, 0.0  ;;  %v2414_v22 = vld [vmem:[#allocation8 + $0x1a0] sm:$0xff] }
 0x89f   :  { %v2366_v30 = vmax.f32 %v2127_v23, 0.0  ;;  %v2368_v31 = vmax.f32 %v2170_v8, 0.0  ;;  %2675 = vmatprep.subr.bf16.mxu1 %v3078_v14  ;;  %2716 = vmatprep.subr.bf16.mxu0 %v3080_v10  ;;  %v3066_v43 = vcombine.high %v3873_v9, %v3875_v32  ;;  %v1814_v59 = vrot.slane %v3843_v37, %v1781_v20  ;;  %v2422_v23 = vld [vmem:[#allocation8 + $0x1e0] sm:$0xff]  ;;  %v2415_v8 = vld [vmem:[#allocation8 + $0x1a8] sm:$0xff] }
 0x8a0   :  { %v2367_v57 = vmax.f32 %v2129_v26, 0.0  ;;  %v2369_v33 = vmax.f32 %v2172_v27, 0.0 }
 0x8a1   :  { %v3881_v58 = vpack.c.bf16 %v2366_v30, %v2350_v28  ;;  %v3883_v12 = vpack.c.bf16 %v2368_v31, %v2352_v29  ;;  %v3067_v29 = vcombine.low %v3877_v54, %v3879_v56 }
 0x8a2   :  { %v2383_v34 = vpack.c.bf16 %v2367_v57, %v2351_v52  ;;  %v2385_v35 = vpack.c.bf16 %v2369_v33, %v2353_v53  ;;  %v2208_v36 = vpop.f32.mrb[28].mxu1  ;;  %v2251_v11 = vpop.f32.mrb[24].mxu0  ;;  %v3082_v57 = vcombine.high %v2414_v22, %v2422_v23  ;;  %v3084_v33 = vcombine.high %v2415_v8, %v2423_v63 }
 0x8a3   :  { %v2209_v1 = vadd.f32 %v2208_v36, %v1794_v55  ;;  %v2252_v2 = vadd.f32 %v2251_v11, %v1802_v3  ;;  %v2210_v41 = vpop.f32.mrb[29].mxu1  ;;  %v2253_v42 = vpop.f32.mrb[25].mxu0 }
 0x8a4   :  { %v2211_v47 = vadd.f32 %v2210_v41, %v1798_v25  ;;  %v2254_v48 = vadd.f32 %v2253_v42, %v1806_v6  ;;  %v2212_v49 = vpop.f32.mrb[30].mxu1  ;;  %v2255_v39 = vpop.f32.mrb[26].mxu0  ;;  %2705 = vmatprep.mubr.bf16.mxu1 %v2383_v34  ;;  %2746 = vmatprep.mubr.bf16.mxu0 %v2385_v35 }
 0x8a5   :  { %v2213_v40 = vadd.f32 %v2212_v49, %v1794_v55  ;;  %v2256_v45 = vadd.f32 %v2255_v39, %v1802_v3  ;;  %v2214_v46 = vpop.f32.mrb[31].mxu1  ;;  %v2257_v50 = vpop.f32.mrb[27].mxu0  ;;  %v2354_v55 = vmax.f32 %v2209_v1, 0.0  ;;  %v2356_v13 = vmax.f32 %v2252_v2, 0.0 }
 0x8a6   :  { %v2215_v60 = vadd.f32 %v2214_v46, %v1798_v25  ;;  %v2258_v7 = vadd.f32 %v2257_v50, %v1806_v6  ;;  %2676 = vmatpush1.bf16.xpose.msra.mxu1 %v3077_v38  ;;  %2717 = vmatpush1.bf16.xpose.msra.mxu0 %v3079_v0  ;;  %v2355_v15 = vmax.f32 %v2211_v47, 0.0  ;;  %v2357_v17 = vmax.f32 %v2254_v48, 0.0  ;;  %v2401_v47 = vld [vmem:[#allocation8 + $0x138] sm:$0xff]  ;;  %v2416_v50 = vld [vmem:[#allocation8 + $0x1b0] sm:$0xff] }
 0x8a7   :  { %v2370_v14 = vmax.f32 %v2213_v40, 0.0  ;;  %v2372_v10 = vmax.f32 %v2256_v45, 0.0  ;;  %2755 = vmatprep.subr.bf16.mxu1 %v3066_v43  ;;  %2796 = vmatprep.subr.bf16.mxu0 %v3068_v44  ;;  %v3065_v25 = vcombine.low %v3873_v9, %v3875_v32  ;;  %v2409_v48 = vld [vmem:[#allocation8 + $0x178] sm:$0xff]  ;;  %v3083_v40 = vcombine.low %v2415_v8, %v2423_v63 }
 0x8a8   :  { %v2371_v18 = vmax.f32 %v2215_v60, 0.0  ;;  %v2373_v19 = vmax.f32 %v2258_v7, 0.0  ;;  %v3072_v46 = vcombine.high %v2401_v47, %v2409_v48  ;;  %v2417_v60 = vld [vmem:[#allocation8 + $0x1b8] sm:$0xff] }
 0x8a9   :  { %v3905_v20 = vpack.c.bf16 %v2370_v14, %v2354_v55  ;;  %v3907_v3 = vpack.c.bf16 %v2372_v10, %v2356_v13  ;;  %v2425_v7 = vld [vmem:[#allocation8 + $0x1f8] sm:$0xff] }
 0x8aa   :  { %v2387_v5 = vpack.c.bf16 %v2371_v18, %v2355_v15  ;;  %v2389_v21 = vpack.c.bf16 %v2373_v19, %v2357_v17  ;;  %v2294_v37 = vpop.f32.mrb[32].mxu1  ;;  %v2337_v24 = vpop.f32.mrb[28].mxu0  ;;  %v3088_v13 = vcombine.high %v2417_v60, %v2425_v7  ;;  %v3087_v10 = vcombine.low %v2417_v60, %v2425_v7  ;;  %v3056_v15 = vld [vmem:[#allocation7 + $0x6] ss:$0 sm:$0xff] }
 0x8ab   :  { %v2295_v26 = vadd.f32 %v2294_v37, %v1810_v4  ;;  %v2338_v27 = vadd.f32 %v2337_v24, %v1818_v51  ;;  %v2296_v6 = vpop.f32.mrb[33].mxu1  ;;  %v2339_v28 = vpop.f32.mrb[29].mxu0 }
 0x8ac   :  { %v2297_v30 = vadd.f32 %v2296_v6, %v1814_v59  ;;  %v2340_v31 = vadd.f32 %v2339_v28, %v1822_v16  ;;  %v2298_v52 = vpop.f32.mrb[34].mxu1  ;;  %v2341_v53 = vpop.f32.mrb[30].mxu0 }
 0x8ad   :  { %v2299_v34 = vadd.f32 %v2298_v52, %v1810_v4  ;;  %v2342_v35 = vadd.f32 %v2341_v53, %v1818_v51  ;;  %2706 = vmatmul.mubr.bf16.vlgmr.msra.gmra.mrb[40].mxu1 %v3881_v58  ;;  %2747 = vmatmul.mubr.bf16.vlgmr.msra.gmra.mrb[36].mxu0 %v3883_v12  ;;  %v2300_v9 = vpop.f32.mrb[35].mxu1  ;;  %v2343_v32 = vpop.f32.mrb[31].mxu0  ;;  %v2358_v38 = vmax.f32 %v2295_v26, 0.0  ;;  %v2360_v54 = vmax.f32 %v2338_v27, 0.0  ;;  %v2400_v58 = vld [vmem:[#allocation8 + $0x130] sm:$0xff] }
 0x8ae   :  { %v2301_v36 = vadd.f32 %v2300_v9, %v1814_v59  ;;  %v2344_v11 = vadd.f32 %v2343_v32, %v1822_v16  ;;  %2756 = vmatpush1.bf16.xpose.msra.mxu1 %v3065_v25  ;;  %2787 = vmatprep.mubr.bf16.mxu1 %v2387_v5  ;;  %v2359_v1 = vmax.f32 %v2297_v30, 0.0  ;;  %v2361_v2 = vmax.f32 %v2340_v31, 0.0  ;;  %v2408_v12 = vld [vmem:[#allocation8 + $0x170] sm:$0xff] }
 0x8af   :  { %v2374_v56 = vmax.f32 %v2299_v34, 0.0  ;;  %v2376_v0 = vmax.f32 %v2342_v35, 0.0  ;;  %2797 = vmatpush1.bf16.xpose.msra.mxu0 %v3067_v29  ;;  %2828 = vmatprep.mubr.bf16.mxu0 %v2389_v21  ;;  %v3081_v4 = vcombine.low %v2414_v22, %v2422_v23  ;;  %v3070_v45 = vcombine.high %v2400_v58, %v2408_v12  ;;  %v2424_v51 = vld [vmem:[#allocation8 + $0x1f0] sm:$0xff] }
 0x8b0   :  { %v2375_v41 = vmax.f32 %v2301_v36, 0.0  ;;  %v2377_v42 = vmax.f32 %v2344_v11, 0.0  ;;  %2757 = vmatprep.subr.bf16.mxu1 %v3082_v57  ;;  %2798 = vmatprep.subr.bf16.mxu0 %v3084_v33  ;;  %v3069_v59 = vcombine.low %v2400_v58, %v2408_v12  ;;  %v3071_v16 = vcombine.low %v2401_v47, %v2409_v48 }
 0x8b1   :  { %v2390_v43 = vpack.c.bf16 %v2374_v56, %v2358_v38  ;;  %v2392_v44 = vpack.c.bf16 %v2376_v0, %v2360_v54  ;;  %v3086_v55 = vcombine.high %v2416_v50, %v2424_v51  ;;  %v3085_v14 = vcombine.low %v2416_v50, %v2424_v51 }
 0x8b2   :  { %v2391_v49 = vpack.c.bf16 %v2375_v41, %v2359_v1  ;;  %v2393_v39 = vpack.c.bf16 %v2377_v42, %v2361_v2 }
 0x8b6   :  { %2758 = vmatpush1.bf16.xpose.msra.mxu1 %v3081_v4 }
 0x8b7   :  { %2799 = vmatpush1.bf16.xpose.msra.mxu0 %v3083_v40  ;;  %2837 = vmatprep.subr.bf16.mxu1 %v3070_v45 }
 0x8b8   :  { %2878 = vmatprep.subr.bf16.mxu0 %v3072_v46 }
 0x8bd   :  { %2788 = vmatmul.mubr.bf16.vlgmr.msra.gmra.mrb[44].mxu1 %v3905_v20 }
 0x8be   :  { %2829 = vmatmul.mubr.bf16.vlgmr.msra.gmra.mrb[40].mxu0 %v3907_v3  ;;  %2838 = vmatpush1.bf16.xpose.msra.mxu1 %v3069_v59 }
 0x8bf   :  { %2869 = vmatprep.mubr.bf16.mxu1 %v2391_v49  ;;  %2879 = vmatpush1.bf16.xpose.msra.mxu0 %v3071_v16 }
 0x8c0   :  { %2910 = vmatprep.mubr.bf16.mxu0 %v2393_v39  ;;  %2839 = vmatprep.subr.bf16.mxu1 %v3086_v55 }
 0x8c1   :  { %2880 = vmatprep.subr.bf16.mxu0 %v3088_v13 }
 0x8c6   :  { %2840 = vmatpush1.bf16.xpose.msra.mxu1 %v3085_v14 }
 0x8c7   :  { %2881 = vmatpush1.bf16.xpose.msra.mxu0 %v3087_v10 }
 0x8cd   :  { %2870 = vmatmul.mubr.bf16.vlgmr.msra.gmra.mrb[48].mxu1 %v2390_v43 }
 0x8ce   :  { %2911 = vmatmul.mubr.bf16.vlgmr.msra.gmra.mrb[44].mxu0 %v2392_v44 }
 0x970   :  { %v2625_v17 = vpop.f32.mrb[36].mxu1  ;;  %v2666_v18 = vpop.f32.mrb[32].mxu0 }
 0x971   :  { %v2626_v19 = vadd.f32 %v3056_v15, %v2625_v17  ;;  %v2627_v22 = vpop.f32.mrb[37].mxu1  ;;  %v2668_v20 = vpop.f32.mrb[33].mxu0 }
 0x972   :  { %v2628_v23 = vpop.f32.mrb[38].mxu1  ;;  %v2669_v3 = vpop.f32.mrb[34].mxu0 }
 0x973   :  { %v2667_v8 = vadd.f32 %v2666_v18, %v2626_v19  ;;  %v2629_v63 = vadd.f32 %v3056_v15, %v2628_v23  ;;  %v2630_v5 = vpop.f32.mrb[39].mxu1  ;;  %v2671_v21 = vpop.f32.mrb[35].mxu0  ;;  %v3089_v23 = vld [vmem:[#allocation7 + $0x7] ss:$0 sm:$0xff] }
 0x975   :  { %v2670_v37 = vadd.f32 %v2669_v3, %v2629_v63  ;;  %v3090_v63 = vld [vmem:[#allocation7 + $0x8] ss:$0 sm:$0xff] }
 0x980   :  { %v2707_v24 = vpop.f32.mrb[40].mxu1  ;;  %v2748_v25 = vpop.f32.mrb[36].mxu0 }
 0x981   :  { %v2708_v26 = vadd.f32 %v2707_v24, %v2667_v8  ;;  %v2709_v27 = vpop.f32.mrb[41].mxu1  ;;  %v2750_v6 = vpop.f32.mrb[37].mxu0 }
 0x982   :  { %v2710_v28 = vpop.f32.mrb[42].mxu1  ;;  %v2751_v29 = vpop.f32.mrb[38].mxu0 }
 0x983   :  { %v2749_v30 = vadd.f32 %v2748_v25, %v2708_v26  ;;  %v2711_v31 = vadd.f32 %v2710_v28, %v2670_v37  ;;  %v2712_v52 = vpop.f32.mrb[43].mxu1  ;;  %v2753_v53 = vpop.f32.mrb[39].mxu0 }
 0x985   :  { %v2752_v57 = vadd.f32 %v2751_v29, %v2711_v31 }
 0x990   :  { %v2789_v33 = vpop.f32.mrb[44].mxu1 }
 0x991   :  { %v2790_v34 = vadd.f32 %v2789_v33, %v2749_v30  ;;  %v2830_v35 = vpop.f32.mrb[40].mxu0  ;;  %v2791_v9 = vpop.f32.mrb[45].mxu1 }
 0x992   :  { %v2832_v32 = vpop.f32.mrb[41].mxu0  ;;  %v2792_v36 = vpop.f32.mrb[46].mxu1 }
 0x993   :  { %v2831_v11 = vadd.f32 %v2830_v35, %v2790_v34  ;;  %v2793_v38 = vadd.f32 %v2792_v36, %v2752_v57  ;;  %v2833_v54 = vpop.f32.mrb[42].mxu0  ;;  %v2794_v56 = vpop.f32.mrb[47].mxu1 }
 0x994   :  { %v2835_v0 = vpop.f32.mrb[43].mxu0 }
 0x995   :  { %v2834_v1 = vadd.f32 %v2833_v54, %v2793_v38 }
 0x9a0   :  { %v2871_v2 = vpop.f32.mrb[48].mxu1 }
 0x9a1   :  { %v2872_v41 = vadd.f32 %v2871_v2, %v2831_v11  ;;  %v2912_v42 = vpop.f32.mrb[44].mxu0  ;;  %v2873_v58 = vpop.f32.mrb[49].mxu1 }
 0x9a2   :  { %v2914_v12 = vpop.f32.mrb[45].mxu0  ;;  %v2874_v43 = vpop.f32.mrb[50].mxu1 }
 0x9a3   :  { %v2913_v44 = vadd.f32 %v2912_v42, %v2872_v41  ;;  %v2875_v47 = vadd.f32 %v2874_v43, %v2834_v1  ;;  %v2915_v48 = vpop.f32.mrb[46].mxu0  ;;  %v2876_v49 = vpop.f32.mrb[51].mxu1 }
 0x9a4   :  { %v2917_v39 = vpop.f32.mrb[47].mxu0 }
 0x9a5   :  { %v2916_v4 = vadd.f32 %v2915_v48, %v2875_v47  ;;  %v2919_v40 = vadd.f32 %v2913_v44, %v3767_v61 }
 0x9a7   :  { %v2923_v45 = vsel %vm83_vm0, %v2919_v40, 0.0  ;;  %v2920_v46 = vadd.f32 %v2916_v4, %v3769_v62 }
 0x9a8   :  { %2924 = vadd.xlane.f32.xlu1 %v2923_v45 }
 0x9a9   :  { %v2926_v50 = vsel %vm83_vm0, %v2920_v46, 0.0 }
 0x9aa   :  { %2927 = vadd.xlane.f32.xlu0 %v2926_v50 }
 0xa35   :  { %v2925_v51 = vpop.xlane.xlu1 %2924 }
 0xa36   :  { %v2929_v59 = vmul.f32 0.03125, %v2925_v51 }
 0xa37   :  { %v2928_v60 = vpop.xlane.xlu0 %2927 }
 0xa38   :  { %v2931_v7 = vsub.f32 %v2919_v40, %v2929_v59  ;;  %v2930_v16 = vmul.f32 0.03125, %v2928_v60 }
 0xa3a   :  { %v2932_v55 = vsub.f32 %v2920_v46, %v2930_v16  ;;  %v2933_v13 = vmul.f32 %v2931_v7, %v2931_v7 }
 0xa3c   :  { %v2935_v14 = vsel %vm83_vm0, %v2933_v13, 0.0  ;;  %v2934_v10 = vmul.f32 %v2932_v55, %v2932_v55 }
 0xa3d   :  { %2936 = vadd.xlane.f32.xlu1 %v2935_v14 }
 0xa3e   :  { %v2938_v61 = vsel %vm83_vm0, %v2934_v10, 0.0 }
 0xa3f   :  { %2939 = vadd.xlane.f32.xlu0 %v2938_v61 }
 0xaca   :  { %v2937_v15 = vpop.xlane.xlu1 %2936 }
 0xacb   :  { %v2941_v62 = vmul.f32 0.03125, %v2937_v15 }
 0xacc   :  { %v2940_v17 = vpop.xlane.xlu0 %2939 }
 0xacd   :  { %v2943_v18 = vadd.f32 1e-05, %v2941_v62  ;;  %v2942_v19 = vmul.f32 0.03125, %v2940_v17 }
 0xacf   :  { %3318 = vrsqrt.f32 %v2943_v18  ;;  %v2944_v22 = vadd.f32 1e-05, %v2942_v19 }
 0xad1   :  { %3320 = vrsqrt.f32 %v2944_v22 }
 0xad9   :  { %v3319_v20 = vpop.eup %3318 }
 0xada   :  { %v2947_v3 = vmul.f32 %v3319_v20, %v2931_v7 }
 0xadb   :  { %v3321_v8 = vpop.eup %3320 }
 0xadc   :  { %v2948_v5 = vmul.f32 %v3321_v8, %v2932_v55  ;;  %v2953_v21 = vmul.f32 %v3089_v23, %v2947_v3 }
 0xade   :  { %v2954_v37 = vmul.f32 %v3089_v23, %v2948_v5  ;;  %v2959_v24 = vadd.f32 %v3090_v63, %v2953_v21 }
 0xae0   :  { %v2960_v25 = vadd.f32 %v3090_v63, %v2954_v37  ;;  %2961 = vst.msk [vmem:[#allocation10] sm:$0xff] %vm83_vm0, %v2959_v24 }
 0xae2   :  { %2962 = vst.msk [vmem:[#allocation10 + $0x8] sm:$0xff] %vm83_vm0, %v2960_v25 }
 0xae3   :  { %3421 = shalt.err (!%p3418_p8)
}
 0xae4   :  { %s3422_s8 = scalar_lea.hbm %s3945_s5, 256 }
 0xae5   :  { %p3423_p9 = scmp.ne.s32.totalorder %s3945_s5, %s3422_s8  ;;  %p3426_p10 = scmp.lt.u32.totalorder %s3422_s8, %s3945_s5 }
 0xae7   :  { %p3428_p11 = pnand %p3426_p10, %p3423_p9 }
 0xae9   :  { %3431 = shalt.err (!%p3428_p11)
}
 0xaea   :  { %2974 = dma.vmem_to_hbm [thread:$0]  %s2969_s29, 256, %s3945_s5, [#allocation4], %s3442_s30, %s3442_s30, %s3443_s6  }
 0xaeb   :  { %3438 = dma.done.wait [#allocation4], 256  }
 0xaec   :  { %3439 = vsyncadd [#allocation4], 4294967040 }
 0xaed   :  { %2978 = vsyncpa [#allocation3], 1 }
 0xaee   :  { %2979 = vsyncpa [#allocation6], 1 }
 0xaef   :  { %2980 = vsyncpa [#allocation9], 1 }
 0xaf0   :  { %2981 = vsyncpa [#allocation4], 1 }

</bundles_post_ra>
